<compile_context>
chip_gen: v5e
topology: v5e:2x2
jax: 0.10.0
libtpu: 0.0.40
codegen_flags: <defaults>
</compile_context>

<pallas_src>
import functools

import jax
import jax.numpy as jnp
from jax.experimental import pallas as pl
from jax.experimental.pallas import tpu as pltpu

n_embd = 192


# ----------------------------------------------------------------------------
# Fused kernel: cross multi-head attention + output projection for all the
# batches assigned to this grid step.
#   q_h   = x  @ WqT_h          (scale folded into Wq)        (G*T,  hs)
#   kT_h  = Wk_h @ en_t                                        (hs,  Te)
#   v_h   = en @ WvT_h                                         (G*Te, hs)
#   wei   = softmax(q_h kT_h); acc += (wei v_h) @ Wp_h
#   out   = acc + b
# ----------------------------------------------------------------------------
def _fused_cross_mha_kernel(x_ref, en_ref, ent_ref, wq_ref, wk_ref, wv_ref,
                            wp_ref, bp_ref, o_ref):
    G = ent_ref.shape[0]                     # batches handled this grid step
    Te = ent_ref.shape[2]
    GT, C = x_ref.shape
    T = GT // G
    H, _, hs = wq_ref.shape

    # bf16 MXU operands (cast once per step), f32 accumulation everywhere.
    x2 = x_ref[...].astype(jnp.bfloat16)     # (G*T,  C)
    en2 = en_ref[...].astype(jnp.bfloat16)   # (G*Te, C)
    # hoisted: per-batch transposed encoder block, cast once (not per head)
    ents = [ent_ref[g].astype(jnp.bfloat16) for g in range(G)]   # each (C, Te)
    bias = bp_ref[...]                       # (1, C) f32

    acc = [None] * G
    for h in range(H):                       # static unroll (H small)
        # 192-deep projections for ALL batches of this step at once.
        q_all = jnp.dot(x2, wq_ref[h], preferred_element_type=jnp.float32)   # (G*T,  hs)
        v_all = jnp.dot(en2, wv_ref[h], preferred_element_type=jnp.float32)  # (G*Te, hs)
        wk_h = wk_ref[h]                     # (hs, C) bf16
        wp_h = wp_ref[h]                     # (hs, C) bf16
        for g in range(G):                   # static unroll (G is 1 or B)
            # k^T directly: plain matmul, no transposed contraction / vxpose.
            kT = jnp.dot(wk_h, ents[g], preferred_element_type=jnp.float32)  # (hs, Te)

            # sublane-aligned f32 row slices (T, Te multiples of 8), then cast.
            q = q_all[g * T:(g + 1) * T].astype(jnp.bfloat16)                # (T,  hs)
            v = v_all[g * Te:(g + 1) * Te].astype(jnp.bfloat16)              # (Te, hs)

            wei = jnp.dot(q, kT.astype(jnp.bfloat16),
                          preferred_element_type=jnp.float32)                # (T, Te)
            # softmax over last axis, f32 (scale already folded into Wq)
            wei = wei - jnp.max(wei, axis=-1, keepdims=True)
            wei = jnp.exp(wei)
            wei = wei * pl.reciprocal(jnp.sum(wei, axis=-1, keepdims=True),
                                      approx=True)

            out_h = jnp.dot(wei.astype(jnp.bfloat16), v,
                            preferred_element_type=jnp.float32)              # (T, hs)
            # fold this head's slice of the output projection in directly
            y_h = jnp.dot(out_h.astype(jnp.bfloat16), wp_h,
                          preferred_element_type=jnp.float32)                # (T, C)
            acc[g] = y_h if acc[g] is None else acc[g] + y_h

    for g in range(G):
        # lane-dense (T, 192) stores at sublane-aligned offsets
        o_ref[pl.ds(g * T, T), :] = acc[g] + bias


def _default_batches_per_step(batch):
    """Batches handled per grid step.

    v7x has 2 TensorCores per chip: keep 2 parallel grid steps so both cores
    work.  Single-TC chips (v5e / v6e): a batch grid is a purely serial loop
    (~0.35 us/step overhead), so collapse to a single step.
    """
    try:
        kind = jax.devices()[0].device_kind.lower()
    except Exception:  # pragma: no cover - defensive
        kind = ""
    if ("v7" in kind or "7x" in kind) and batch % 2 == 0 and batch >= 2:
        return batch // 2
    return batch


def cross_mha_fused(x, en_out, wq_t, wk_h, wv_t, wp_heads, bp2,
                    *, batches_per_step=None):
    """x: (B,T,C) f32, en_out: (B,Te,C) f32,
    wq_t/wv_t: (H,C,hs) bf16 (pre-transposed, scale folded into wq_t),
    wk_h: (H,hs,C) bf16, wp_heads: (H,hs,C) bf16, bp2: (1,C) f32 -> (B,T,C) f32."""
    B, T, C = x.shape
    _, Te, _ = en_out.shape
    H, _, hs = wq_t.shape

    G = _default_batches_per_step(B) if batches_per_step is None else batches_per_step
    assert B % G == 0
    steps = B // G

    # Wrapper-side reshapes / transpose are free layout plumbing.
    x2 = x.reshape(B * T, C)                       # (B*T,  C) f32
    en2 = en_out.reshape(B * Te, C)                # (B*Te, C) f32
    en_t = jnp.transpose(en_out, (0, 2, 1))        # (B, C, Te) f32

    out2 = pl.pallas_call(
        _fused_cross_mha_kernel,
        out_shape=jax.ShapeDtypeStruct((B * T, C), jnp.float32),
        grid_spec=pltpu.PrefetchScalarGridSpec(
            num_scalar_prefetch=0,
            grid=(steps,),
            in_specs=[
                pl.BlockSpec((G * T, C), lambda b: (b, 0)),
                pl.BlockSpec((G * Te, C), lambda b: (b, 0)),
                pl.BlockSpec((G, C, Te), lambda b: (b, 0, 0)),
                # weights: constant block index -> resident across grid steps
                pl.BlockSpec((H, C, hs), lambda b: (0, 0, 0)),
                pl.BlockSpec((H, hs, C), lambda b: (0, 0, 0)),
                pl.BlockSpec((H, C, hs), lambda b: (0, 0, 0)),
                pl.BlockSpec((H, hs, C), lambda b: (0, 0, 0)),
                pl.BlockSpec((1, C), lambda b: (0, 0)),
            ],
            out_specs=pl.BlockSpec((G * T, C), lambda b: (b, 0)),
        ),
        compiler_params=pltpu.CompilerParams(
            dimension_semantics=("parallel",)),
    )(x2, en2, en_t, wq_t, wk_h, wv_t, wp_heads, bp2)
    return out2.reshape(B, T, C)


# ----------------------------------------------------------------------------
# Module wrapper
# ----------------------------------------------------------------------------
class CrossMultiHeadAttentionPallas:
    def __init__(self, num_heads, head_size, key):
        self.num_heads = num_heads
        self.head_size = head_size
        H, hs = num_heads, head_size
        k1, k2, k3, k4, k5 = jax.random.split(key, 5)

        # PyTorch-layout parameters (Linear weight is (out, in); y = x @ W^T).
        scale_in = 1.0 / jnp.sqrt(jnp.float32(n_embd))
        self.wq = jax.random.normal(k1, (H, hs, n_embd), jnp.float32) * scale_in
        self.wk = jax.random.normal(k2, (H, hs, n_embd), jnp.float32) * scale_in
        self.wv = jax.random.normal(k3, (H, hs, n_embd), jnp.float32) * scale_in
        scale_p = 1.0 / jnp.sqrt(jnp.float32(H * hs))
        self.wp = jax.random.normal(k4, (n_embd, H * hs), jnp.float32) * scale_p
        self.bp = jax.random.normal(k5, (n_embd,), jnp.float32) * scale_p

        # Kernel-friendly packing, done once at init (outside the hot path):
        #   - per-head stacking indexed on the first axis (no lane slices),
        #   - transposed so the kernel never transposes,
        #   - 1/sqrt(hs) folded into Wq,
        #   - bf16 MXU operands (weight DMA dominates; f32 accumulation kept).
        att_scale = jnp.float32(hs) ** jnp.float32(-0.5)
        self.wq_t = (jnp.transpose(self.wq, (0, 2, 1)) * att_scale
                     ).astype(jnp.bfloat16)                           # (H, C, hs)
        self.wk_h = self.wk.astype(jnp.bfloat16)                      # (H, hs, C)
        self.wv_t = jnp.transpose(self.wv, (0, 2, 1)).astype(jnp.bfloat16)  # (H, C, hs)
        self.wp_heads = self.wp.T.reshape(H, hs, n_embd).astype(jnp.bfloat16)  # (H, hs, C)
        self.bp2 = self.bp.reshape(1, n_embd)                         # (1, C) f32

    @functools.partial(jax.jit, static_argnums=0)
    def __call__(self, x, en_out=None):
        if en_out is None:
            en_out = x
        # final dropout == identity in eval mode
        return cross_mha_fused(x, en_out, self.wq_t, self.wk_h, self.wv_t,
                               self.wp_heads, self.bp2)


# ----------------------------------------------------------------------------
# Pure-JAX f32 reference for correctness check (uses PyTorch-layout params)
# ----------------------------------------------------------------------------
def reference_forward(m, x, en_out):
    outs = []
    for h in range(m.num_heads):
        q = x @ m.wq[h].T
        k = en_out @ m.wk[h].T
        v = en_out @ m.wv[h].T
        wei = (q @ jnp.swapaxes(k, -2, -1)) * (k.shape[-1] ** -0.5)
        wei = jax.nn.softmax(wei, axis=-1)
        outs.append(wei @ v)
    out = jnp.concatenate(outs, axis=-1)
    return out @ m.wp.T + m.bp


if __name__ == "__main__":
    key = jax.random.PRNGKey(0)
    kp, kx, ke = jax.random.split(key, 3)

    num_heads, head_size = 4, 48          # 4 * 48 = 192 = n_embd
    B, T, Te = 2, 8, 8

    module = CrossMultiHeadAttentionPallas(num_heads, head_size, kp)
    x = jax.random.normal(kx, (B, T, n_embd), jnp.float32)
    en_out = jax.random.normal(ke, (B, Te, n_embd), jnp.float32)

    y = module(x, en_out)
    y = jax.block_until_ready(y)

    y_ref = reference_forward(module, x, en_out)
    assert y.shape == (B, T, n_embd)
    # tolerance covers bf16 MXU operands + approx (EUP) softmax reciprocal
    assert jnp.allclose(y, y_ref, atol=5e-2, rtol=5e-2), "mismatch vs reference"

    # also exercise the en_out=x default path of the (buggy) upstream signature
    y_self = jax.block_until_ready(module(x))
    y_self_ref = reference_forward(module, x, x)
    assert jnp.allclose(y_self, y_self_ref, atol=5e-2, rtol=5e-2), \
        "self-attn path mismatch"

    print("KERNEL_OK")
</pallas_src>

<mosaic_0001>
module attributes {stable_mosaic.version = 11 : i64} {
  func.func @_fused_cross_mha_kernel(%arg0: i32, %arg1: memref<16x192xf32, #tpu.memory_space<vmem>>, %arg2: memref<16x192xf32, #tpu.memory_space<vmem>>, %arg3: memref<2x192x8xf32, #tpu.memory_space<vmem>>, %arg4: memref<4x192x48xbf16, #tpu.memory_space<vmem>>, %arg5: memref<4x48x192xbf16, #tpu.memory_space<vmem>>, %arg6: memref<4x192x48xbf16, #tpu.memory_space<vmem>>, %arg7: memref<4x48x192xbf16, #tpu.memory_space<vmem>>, %arg8: memref<1x192xf32, #tpu.memory_space<vmem>>, %arg9: memref<16x192xf32, #tpu.memory_space<vmem>>) attributes {dimension_semantics = [#tpu.dimension_semantics<parallel>], iteration_bounds = array<i64: 1>, scalar_prefetch = 0 : i64, scratch_operands = 0 : i64, tpu.core_type = #tpu.core_type<tc>, window_params = [{transform_indices = @transform_0, window_bounds = array<i64: 16, 192>}, {transform_indices = @transform_1, window_bounds = array<i64: 16, 192>}, {transform_indices = @transform_2, window_bounds = array<i64: 2, 192, 8>}, {pipeline_mode = #tpu.pipeline_mode<synchronous>, transform_indices = @transform_3, window_bounds = array<i64: 4, 192, 48>}, {pipeline_mode = #tpu.pipeline_mode<synchronous>, transform_indices = @transform_4, window_bounds = array<i64: 4, 48, 192>}, {pipeline_mode = #tpu.pipeline_mode<synchronous>, transform_indices = @transform_5, window_bounds = array<i64: 4, 192, 48>}, {pipeline_mode = #tpu.pipeline_mode<synchronous>, transform_indices = @transform_6, window_bounds = array<i64: 4, 48, 192>}, {pipeline_mode = #tpu.pipeline_mode<synchronous>, transform_indices = @transform_7, window_bounds = array<i64: 1, 192>}, {transform_indices = @transform_8, window_bounds = array<i64: 16, 192>}]} {
    %c0 = arith.constant 0 : index
    %c0_0 = arith.constant 0 : index
    %0 = vector.load %arg1[%c0, %c0_0] : memref<16x192xf32, #tpu.memory_space<vmem>>, vector<16x192xf32>
    %1 = arith.truncf %0 : vector<16x192xf32> to vector<16x192xbf16>
    %c0_1 = arith.constant 0 : index
    %c0_2 = arith.constant 0 : index
    %2 = vector.load %arg2[%c0_1, %c0_2] : memref<16x192xf32, #tpu.memory_space<vmem>>, vector<16x192xf32>
    %3 = arith.truncf %2 : vector<16x192xf32> to vector<16x192xbf16>
    %c0_3 = arith.constant 0 : index
    %c0_4 = arith.constant 0 : index
    %c0_5 = arith.constant 0 : index
    %4 = vector.load %arg3[%c0_3, %c0_4, %c0_5] : memref<2x192x8xf32, #tpu.memory_space<vmem>>, vector<1x192x8xf32>
    %5 = vector.shape_cast %4 : vector<1x192x8xf32> to vector<192x8xf32>
    %6 = arith.truncf %5 : vector<192x8xf32> to vector<192x8xbf16>
    %c1 = arith.constant 1 : index
    %c0_6 = arith.constant 0 : index
    %c0_7 = arith.constant 0 : index
    %7 = vector.load %arg3[%c1, %c0_6, %c0_7] : memref<2x192x8xf32, #tpu.memory_space<vmem>>, vector<1x192x8xf32>
    %8 = vector.shape_cast %7 : vector<1x192x8xf32> to vector<192x8xf32>
    %9 = arith.truncf %8 : vector<192x8xf32> to vector<192x8xbf16>
    %c0_8 = arith.constant 0 : index
    %c0_9 = arith.constant 0 : index
    %10 = vector.load %arg8[%c0_8, %c0_9] : memref<1x192xf32, #tpu.memory_space<vmem>>, vector<1x192xf32>
    %c0_10 = arith.constant 0 : index
    %c0_11 = arith.constant 0 : index
    %c0_12 = arith.constant 0 : index
    %11 = vector.load %arg4[%c0_10, %c0_11, %c0_12] : memref<4x192x48xbf16, #tpu.memory_space<vmem>>, vector<1x192x48xbf16>
    %12 = vector.shape_cast %11 : vector<1x192x48xbf16> to vector<192x48xbf16>
    %cst = arith.constant dense<0.000000e+00> : vector<16x48xf32>
    %13 = tpu.matmul %1, %12, %cst {dimension_numbers = #tpu.dot_dimension_numbers<[1], [0], [0], [1], [0, 0, 1, 1], [], []>} : vector<16x192xbf16>, vector<192x48xbf16>, vector<16x48xf32> -> vector<16x48xf32>
    %c0_13 = arith.constant 0 : index
    %c0_14 = arith.constant 0 : index
    %c0_15 = arith.constant 0 : index
    %14 = vector.load %arg6[%c0_13, %c0_14, %c0_15] : memref<4x192x48xbf16, #tpu.memory_space<vmem>>, vector<1x192x48xbf16>
    %15 = vector.shape_cast %14 : vector<1x192x48xbf16> to vector<192x48xbf16>
    %cst_16 = arith.constant dense<0.000000e+00> : vector<16x48xf32>
    %16 = tpu.matmul %3, %15, %cst_16 {dimension_numbers = #tpu.dot_dimension_numbers<[1], [0], [0], [1], [0, 0, 1, 1], [], []>} : vector<16x192xbf16>, vector<192x48xbf16>, vector<16x48xf32> -> vector<16x48xf32>
    %c0_17 = arith.constant 0 : index
    %c0_18 = arith.constant 0 : index
    %c0_19 = arith.constant 0 : index
    %17 = vector.load %arg5[%c0_17, %c0_18, %c0_19] : memref<4x48x192xbf16, #tpu.memory_space<vmem>>, vector<1x48x192xbf16>
    %18 = vector.shape_cast %17 : vector<1x48x192xbf16> to vector<48x192xbf16>
    %c0_20 = arith.constant 0 : index
    %c0_21 = arith.constant 0 : index
    %c0_22 = arith.constant 0 : index
    %19 = vector.load %arg7[%c0_20, %c0_21, %c0_22] : memref<4x48x192xbf16, #tpu.memory_space<vmem>>, vector<1x48x192xbf16>
    %20 = vector.shape_cast %19 : vector<1x48x192xbf16> to vector<48x192xbf16>
    %cst_23 = arith.constant dense<0.000000e+00> : vector<48x8xf32>
    %21 = tpu.matmul %18, %6, %cst_23 {dimension_numbers = #tpu.dot_dimension_numbers<[1], [0], [0], [1], [0, 0, 1, 1], [], []>} : vector<48x192xbf16>, vector<192x8xbf16>, vector<48x8xf32> -> vector<48x8xf32>
    %22 = vector.extract_strided_slice %13 {offsets = [0, 0], sizes = [8, 48], strides = [1, 1]} : vector<16x48xf32> to vector<8x48xf32>
    %23 = arith.truncf %22 : vector<8x48xf32> to vector<8x48xbf16>
    %24 = vector.extract_strided_slice %16 {offsets = [0, 0], sizes = [8, 48], strides = [1, 1]} : vector<16x48xf32> to vector<8x48xf32>
    %25 = arith.truncf %24 : vector<8x48xf32> to vector<8x48xbf16>
    %26 = arith.truncf %21 : vector<48x8xf32> to vector<48x8xbf16>
    %cst_24 = arith.constant dense<0.000000e+00> : vector<8x8xf32>
    %27 = tpu.matmul %23, %26, %cst_24 {dimension_numbers = #tpu.dot_dimension_numbers<[1], [0], [0], [1], [0, 0, 1, 1], [], []>} : vector<8x48xbf16>, vector<48x8xbf16>, vector<8x8xf32> -> vector<8x8xf32>
    %cst_25 = arith.constant dense<0xFF800000> : vector<8xf32>
    %28 = vector.multi_reduction <maximumf>, %27, %cst_25 [1] : vector<8x8xf32> to vector<8xf32>
    %29 = vector.shape_cast %28 : vector<8xf32> to vector<8x1xf32>
    %30 = vector.broadcast %29 : vector<8x1xf32> to vector<8x8xf32>
    %31 = arith.subf %27, %30 : vector<8x8xf32>
    %32 = math.exp %31 : vector<8x8xf32>
    %cst_26 = arith.constant dense<0.000000e+00> : vector<8xf32>
    %33 = vector.multi_reduction <add>, %32, %cst_26 [1] : vector<8x8xf32> to vector<8xf32>
    %34 = vector.shape_cast %33 : vector<8xf32> to vector<8x1xf32>
    %35 = tpu.reciprocal %34 {approx = true} : vector<8x1xf32> -> vector<8x1xf32>
    %36 = vector.broadcast %35 : vector<8x1xf32> to vector<8x8xf32>
    %37 = arith.mulf %32, %36 : vector<8x8xf32>
    %38 = arith.truncf %37 : vector<8x8xf32> to vector<8x8xbf16>
    %cst_27 = arith.constant dense<0.000000e+00> : vector<8x48xf32>
    %39 = tpu.matmul %38, %25, %cst_27 {dimension_numbers = #tpu.dot_dimension_numbers<[1], [0], [0], [1], [0, 0, 1, 1], [], []>} : vector<8x8xbf16>, vector<8x48xbf16>, vector<8x48xf32> -> vector<8x48xf32>
    %40 = arith.truncf %39 : vector<8x48xf32> to vector<8x48xbf16>
    %cst_28 = arith.constant dense<0.000000e+00> : vector<8x192xf32>
    %41 = tpu.matmul %40, %20, %cst_28 {dimension_numbers = #tpu.dot_dimension_numbers<[1], [0], [0], [1], [0, 0, 1, 1], [], []>} : vector<8x48xbf16>, vector<48x192xbf16>, vector<8x192xf32> -> vector<8x192xf32>
    %cst_29 = arith.constant dense<0.000000e+00> : vector<48x8xf32>
    %42 = tpu.matmul %18, %9, %cst_29 {dimension_numbers = #tpu.dot_dimension_numbers<[1], [0], [0], [1], [0, 0, 1, 1], [], []>} : vector<48x192xbf16>, vector<192x8xbf16>, vector<48x8xf32> -> vector<48x8xf32>
    %43 = vector.extract_strided_slice %13 {offsets = [8, 0], sizes = [8, 48], strides = [1, 1]} : vector<16x48xf32> to vector<8x48xf32>
    %44 = arith.truncf %43 : vector<8x48xf32> to vector<8x48xbf16>
    %45 = vector.extract_strided_slice %16 {offsets = [8, 0], sizes = [8, 48], strides = [1, 1]} : vector<16x48xf32> to vector<8x48xf32>
    %46 = arith.truncf %45 : vector<8x48xf32> to vector<8x48xbf16>
    %47 = arith.truncf %42 : vector<48x8xf32> to vector<48x8xbf16>
    %cst_30 = arith.constant dense<0.000000e+00> : vector<8x8xf32>
    %48 = tpu.matmul %44, %47, %cst_30 {dimension_numbers = #tpu.dot_dimension_numbers<[1], [0], [0], [1], [0, 0, 1, 1], [], []>} : vector<8x48xbf16>, vector<48x8xbf16>, vector<8x8xf32> -> vector<8x8xf32>
    %cst_31 = arith.constant dense<0xFF800000> : vector<8xf32>
    %49 = vector.multi_reduction <maximumf>, %48, %cst_31 [1] : vector<8x8xf32> to vector<8xf32>
    %50 = vector.shape_cast %49 : vector<8xf32> to vector<8x1xf32>
    %51 = vector.broadcast %50 : vector<8x1xf32> to vector<8x8xf32>
    %52 = arith.subf %48, %51 : vector<8x8xf32>
    %53 = math.exp %52 : vector<8x8xf32>
    %cst_32 = arith.constant dense<0.000000e+00> : vector<8xf32>
    %54 = vector.multi_reduction <add>, %53, %cst_32 [1] : vector<8x8xf32> to vector<8xf32>
    %55 = vector.shape_cast %54 : vector<8xf32> to vector<8x1xf32>
    %56 = tpu.reciprocal %55 {approx = true} : vector<8x1xf32> -> vector<8x1xf32>
    %57 = vector.broadcast %56 : vector<8x1xf32> to vector<8x8xf32>
    %58 = arith.mulf %53, %57 : vector<8x8xf32>
    %59 = arith.truncf %58 : vector<8x8xf32> to vector<8x8xbf16>
    %cst_33 = arith.constant dense<0.000000e+00> : vector<8x48xf32>
    %60 = tpu.matmul %59, %46, %cst_33 {dimension_numbers = #tpu.dot_dimension_numbers<[1], [0], [0], [1], [0, 0, 1, 1], [], []>} : vector<8x8xbf16>, vector<8x48xbf16>, vector<8x48xf32> -> vector<8x48xf32>
    %61 = arith.truncf %60 : vector<8x48xf32> to vector<8x48xbf16>
    %cst_34 = arith.constant dense<0.000000e+00> : vector<8x192xf32>
    %62 = tpu.matmul %61, %20, %cst_34 {dimension_numbers = #tpu.dot_dimension_numbers<[1], [0], [0], [1], [0, 0, 1, 1], [], []>} : vector<8x48xbf16>, vector<48x192xbf16>, vector<8x192xf32> -> vector<8x192xf32>
    %c1_35 = arith.constant 1 : index
    %c0_36 = arith.constant 0 : index
    %c0_37 = arith.constant 0 : index
    %63 = vector.load %arg4[%c1_35, %c0_36, %c0_37] : memref<4x192x48xbf16, #tpu.memory_space<vmem>>, vector<1x192x48xbf16>
    %64 = vector.shape_cast %63 : vector<1x192x48xbf16> to vector<192x48xbf16>
    %cst_38 = arith.constant dense<0.000000e+00> : vector<16x48xf32>
    %65 = tpu.matmul %1, %64, %cst_38 {dimension_numbers = #tpu.dot_dimension_numbers<[1], [0], [0], [1], [0, 0, 1, 1], [], []>} : vector<16x192xbf16>, vector<192x48xbf16>, vector<16x48xf32> -> vector<16x48xf32>
    %c1_39 = arith.constant 1 : index
    %c0_40 = arith.constant 0 : index
    %c0_41 = arith.constant 0 : index
    %66 = vector.load %arg6[%c1_39, %c0_40, %c0_41] : memref<4x192x48xbf16, #tpu.memory_space<vmem>>, vector<1x192x48xbf16>
    %67 = vector.shape_cast %66 : vector<1x192x48xbf16> to vector<192x48xbf16>
    %cst_42 = arith.constant dense<0.000000e+00> : vector<16x48xf32>
    %68 = tpu.matmul %3, %67, %cst_42 {dimension_numbers = #tpu.dot_dimension_numbers<[1], [0], [0], [1], [0, 0, 1, 1], [], []>} : vector<16x192xbf16>, vector<192x48xbf16>, vector<16x48xf32> -> vector<16x48xf32>
    %c1_43 = arith.constant 1 : index
    %c0_44 = arith.constant 0 : index
    %c0_45 = arith.constant 0 : index
    %69 = vector.load %arg5[%c1_43, %c0_44, %c0_45] : memref<4x48x192xbf16, #tpu.memory_space<vmem>>, vector<1x48x192xbf16>
    %70 = vector.shape_cast %69 : vector<1x48x192xbf16> to vector<48x192xbf16>
    %c1_46 = arith.constant 1 : index
    %c0_47 = arith.constant 0 : index
    %c0_48 = arith.constant 0 : index
    %71 = vector.load %arg7[%c1_46, %c0_47, %c0_48] : memref<4x48x192xbf16, #tpu.memory_space<vmem>>, vector<1x48x192xbf16>
    %72 = vector.shape_cast %71 : vector<1x48x192xbf16> to vector<48x192xbf16>
    %cst_49 = arith.constant dense<0.000000e+00> : vector<48x8xf32>
    %73 = tpu.matmul %70, %6, %cst_49 {dimension_numbers = #tpu.dot_dimension_numbers<[1], [0], [0], [1], [0, 0, 1, 1], [], []>} : vector<48x192xbf16>, vector<192x8xbf16>, vector<48x8xf32> -> vector<48x8xf32>
    %74 = vector.extract_strided_slice %65 {offsets = [0, 0], sizes = [8, 48], strides = [1, 1]} : vector<16x48xf32> to vector<8x48xf32>
    %75 = arith.truncf %74 : vector<8x48xf32> to vector<8x48xbf16>
    %76 = vector.extract_strided_slice %68 {offsets = [0, 0], sizes = [8, 48], strides = [1, 1]} : vector<16x48xf32> to vector<8x48xf32>
    %77 = arith.truncf %76 : vector<8x48xf32> to vector<8x48xbf16>
    %78 = arith.truncf %73 : vector<48x8xf32> to vector<48x8xbf16>
    %cst_50 = arith.constant dense<0.000000e+00> : vector<8x8xf32>
    %79 = tpu.matmul %75, %78, %cst_50 {dimension_numbers = #tpu.dot_dimension_numbers<[1], [0], [0], [1], [0, 0, 1, 1], [], []>} : vector<8x48xbf16>, vector<48x8xbf16>, vector<8x8xf32> -> vector<8x8xf32>
    %cst_51 = arith.constant dense<0xFF800000> : vector<8xf32>
    %80 = vector.multi_reduction <maximumf>, %79, %cst_51 [1] : vector<8x8xf32> to vector<8xf32>
    %81 = vector.shape_cast %80 : vector<8xf32> to vector<8x1xf32>
    %82 = vector.broadcast %81 : vector<8x1xf32> to vector<8x8xf32>
    %83 = arith.subf %79, %82 : vector<8x8xf32>
    %84 = math.exp %83 : vector<8x8xf32>
    %cst_52 = arith.constant dense<0.000000e+00> : vector<8xf32>
    %85 = vector.multi_reduction <add>, %84, %cst_52 [1] : vector<8x8xf32> to vector<8xf32>
    %86 = vector.shape_cast %85 : vector<8xf32> to vector<8x1xf32>
    %87 = tpu.reciprocal %86 {approx = true} : vector<8x1xf32> -> vector<8x1xf32>
    %88 = vector.broadcast %87 : vector<8x1xf32> to vector<8x8xf32>
    %89 = arith.mulf %84, %88 : vector<8x8xf32>
    %90 = arith.truncf %89 : vector<8x8xf32> to vector<8x8xbf16>
    %cst_53 = arith.constant dense<0.000000e+00> : vector<8x48xf32>
    %91 = tpu.matmul %90, %77, %cst_53 {dimension_numbers = #tpu.dot_dimension_numbers<[1], [0], [0], [1], [0, 0, 1, 1], [], []>} : vector<8x8xbf16>, vector<8x48xbf16>, vector<8x48xf32> -> vector<8x48xf32>
    %92 = arith.truncf %91 : vector<8x48xf32> to vector<8x48xbf16>
    %cst_54 = arith.constant dense<0.000000e+00> : vector<8x192xf32>
    %93 = tpu.matmul %92, %72, %cst_54 {dimension_numbers = #tpu.dot_dimension_numbers<[1], [0], [0], [1], [0, 0, 1, 1], [], []>} : vector<8x48xbf16>, vector<48x192xbf16>, vector<8x192xf32> -> vector<8x192xf32>
    %94 = arith.addf %41, %93 : vector<8x192xf32>
    %cst_55 = arith.constant dense<0.000000e+00> : vector<48x8xf32>
    %95 = tpu.matmul %70, %9, %cst_55 {dimension_numbers = #tpu.dot_dimension_numbers<[1], [0], [0], [1], [0, 0, 1, 1], [], []>} : vector<48x192xbf16>, vector<192x8xbf16>, vector<48x8xf32> -> vector<48x8xf32>
    %96 = vector.extract_strided_slice %65 {offsets = [8, 0], sizes = [8, 48], strides = [1, 1]} : vector<16x48xf32> to vector<8x48xf32>
    %97 = arith.truncf %96 : vector<8x48xf32> to vector<8x48xbf16>
    %98 = vector.extract_strided_slice %68 {offsets = [8, 0], sizes = [8, 48], strides = [1, 1]} : vector<16x48xf32> to vector<8x48xf32>
    %99 = arith.truncf %98 : vector<8x48xf32> to vector<8x48xbf16>
    %100 = arith.truncf %95 : vector<48x8xf32> to vector<48x8xbf16>
    %cst_56 = arith.constant dense<0.000000e+00> : vector<8x8xf32>
    %101 = tpu.matmul %97, %100, %cst_56 {dimension_numbers = #tpu.dot_dimension_numbers<[1], [0], [0], [1], [0, 0, 1, 1], [], []>} : vector<8x48xbf16>, vector<48x8xbf16>, vector<8x8xf32> -> vector<8x8xf32>
    %cst_57 = arith.constant dense<0xFF800000> : vector<8xf32>
    %102 = vector.multi_reduction <maximumf>, %101, %cst_57 [1] : vector<8x8xf32> to vector<8xf32>
    %103 = vector.shape_cast %102 : vector<8xf32> to vector<8x1xf32>
    %104 = vector.broadcast %103 : vector<8x1xf32> to vector<8x8xf32>
    %105 = arith.subf %101, %104 : vector<8x8xf32>
    %106 = math.exp %105 : vector<8x8xf32>
    %cst_58 = arith.constant dense<0.000000e+00> : vector<8xf32>
    %107 = vector.multi_reduction <add>, %106, %cst_58 [1] : vector<8x8xf32> to vector<8xf32>
    %108 = vector.shape_cast %107 : vector<8xf32> to vector<8x1xf32>
    %109 = tpu.reciprocal %108 {approx = true} : vector<8x1xf32> -> vector<8x1xf32>
    %110 = vector.broadcast %109 : vector<8x1xf32> to vector<8x8xf32>
    %111 = arith.mulf %106, %110 : vector<8x8xf32>
    %112 = arith.truncf %111 : vector<8x8xf32> to vector<8x8xbf16>
    %cst_59 = arith.constant dense<0.000000e+00> : vector<8x48xf32>
    %113 = tpu.matmul %112, %99, %cst_59 {dimension_numbers = #tpu.dot_dimension_numbers<[1], [0], [0], [1], [0, 0, 1, 1], [], []>} : vector<8x8xbf16>, vector<8x48xbf16>, vector<8x48xf32> -> vector<8x48xf32>
    %114 = arith.truncf %113 : vector<8x48xf32> to vector<8x48xbf16>
    %cst_60 = arith.constant dense<0.000000e+00> : vector<8x192xf32>
    %115 = tpu.matmul %114, %72, %cst_60 {dimension_numbers = #tpu.dot_dimension_numbers<[1], [0], [0], [1], [0, 0, 1, 1], [], []>} : vector<8x48xbf16>, vector<48x192xbf16>, vector<8x192xf32> -> vector<8x192xf32>
    %116 = arith.addf %62, %115 : vector<8x192xf32>
    %c2 = arith.constant 2 : index
    %c0_61 = arith.constant 0 : index
    %c0_62 = arith.constant 0 : index
    %117 = vector.load %arg4[%c2, %c0_61, %c0_62] : memref<4x192x48xbf16, #tpu.memory_space<vmem>>, vector<1x192x48xbf16>
    %118 = vector.shape_cast %117 : vector<1x192x48xbf16> to vector<192x48xbf16>
    %cst_63 = arith.constant dense<0.000000e+00> : vector<16x48xf32>
    %119 = tpu.matmul %1, %118, %cst_63 {dimension_numbers = #tpu.dot_dimension_numbers<[1], [0], [0], [1], [0, 0, 1, 1], [], []>} : vector<16x192xbf16>, vector<192x48xbf16>, vector<16x48xf32> -> vector<16x48xf32>
    %c2_64 = arith.constant 2 : index
    %c0_65 = arith.constant 0 : index
    %c0_66 = arith.constant 0 : index
    %120 = vector.load %arg6[%c2_64, %c0_65, %c0_66] : memref<4x192x48xbf16, #tpu.memory_space<vmem>>, vector<1x192x48xbf16>
    %121 = vector.shape_cast %120 : vector<1x192x48xbf16> to vector<192x48xbf16>
    %cst_67 = arith.constant dense<0.000000e+00> : vector<16x48xf32>
    %122 = tpu.matmul %3, %121, %cst_67 {dimension_numbers = #tpu.dot_dimension_numbers<[1], [0], [0], [1], [0, 0, 1, 1], [], []>} : vector<16x192xbf16>, vector<192x48xbf16>, vector<16x48xf32> -> vector<16x48xf32>
    %c2_68 = arith.constant 2 : index
    %c0_69 = arith.constant 0 : index
    %c0_70 = arith.constant 0 : index
    %123 = vector.load %arg5[%c2_68, %c0_69, %c0_70] : memref<4x48x192xbf16, #tpu.memory_space<vmem>>, vector<1x48x192xbf16>
    %124 = vector.shape_cast %123 : vector<1x48x192xbf16> to vector<48x192xbf16>
    %c2_71 = arith.constant 2 : index
    %c0_72 = arith.constant 0 : index
    %c0_73 = arith.constant 0 : index
    %125 = vector.load %arg7[%c2_71, %c0_72, %c0_73] : memref<4x48x192xbf16, #tpu.memory_space<vmem>>, vector<1x48x192xbf16>
    %126 = vector.shape_cast %125 : vector<1x48x192xbf16> to vector<48x192xbf16>
    %cst_74 = arith.constant dense<0.000000e+00> : vector<48x8xf32>
    %127 = tpu.matmul %124, %6, %cst_74 {dimension_numbers = #tpu.dot_dimension_numbers<[1], [0], [0], [1], [0, 0, 1, 1], [], []>} : vector<48x192xbf16>, vector<192x8xbf16>, vector<48x8xf32> -> vector<48x8xf32>
    %128 = vector.extract_strided_slice %119 {offsets = [0, 0], sizes = [8, 48], strides = [1, 1]} : vector<16x48xf32> to vector<8x48xf32>
    %129 = arith.truncf %128 : vector<8x48xf32> to vector<8x48xbf16>
    %130 = vector.extract_strided_slice %122 {offsets = [0, 0], sizes = [8, 48], strides = [1, 1]} : vector<16x48xf32> to vector<8x48xf32>
    %131 = arith.truncf %130 : vector<8x48xf32> to vector<8x48xbf16>
    %132 = arith.truncf %127 : vector<48x8xf32> to vector<48x8xbf16>
    %cst_75 = arith.constant dense<0.000000e+00> : vector<8x8xf32>
    %133 = tpu.matmul %129, %132, %cst_75 {dimension_numbers = #tpu.dot_dimension_numbers<[1], [0], [0], [1], [0, 0, 1, 1], [], []>} : vector<8x48xbf16>, vector<48x8xbf16>, vector<8x8xf32> -> vector<8x8xf32>
    %cst_76 = arith.constant dense<0xFF800000> : vector<8xf32>
    %134 = vector.multi_reduction <maximumf>, %133, %cst_76 [1] : vector<8x8xf32> to vector<8xf32>
    %135 = vector.shape_cast %134 : vector<8xf32> to vector<8x1xf32>
    %136 = vector.broadcast %135 : vector<8x1xf32> to vector<8x8xf32>
    %137 = arith.subf %133, %136 : vector<8x8xf32>
    %138 = math.exp %137 : vector<8x8xf32>
    %cst_77 = arith.constant dense<0.000000e+00> : vector<8xf32>
    %139 = vector.multi_reduction <add>, %138, %cst_77 [1] : vector<8x8xf32> to vector<8xf32>
    %140 = vector.shape_cast %139 : vector<8xf32> to vector<8x1xf32>
    %141 = tpu.reciprocal %140 {approx = true} : vector<8x1xf32> -> vector<8x1xf32>
    %142 = vector.broadcast %141 : vector<8x1xf32> to vector<8x8xf32>
    %143 = arith.mulf %138, %142 : vector<8x8xf32>
    %144 = arith.truncf %143 : vector<8x8xf32> to vector<8x8xbf16>
    %cst_78 = arith.constant dense<0.000000e+00> : vector<8x48xf32>
    %145 = tpu.matmul %144, %131, %cst_78 {dimension_numbers = #tpu.dot_dimension_numbers<[1], [0], [0], [1], [0, 0, 1, 1], [], []>} : vector<8x8xbf16>, vector<8x48xbf16>, vector<8x48xf32> -> vector<8x48xf32>
    %146 = arith.truncf %145 : vector<8x48xf32> to vector<8x48xbf16>
    %cst_79 = arith.constant dense<0.000000e+00> : vector<8x192xf32>
    %147 = tpu.matmul %146, %126, %cst_79 {dimension_numbers = #tpu.dot_dimension_numbers<[1], [0], [0], [1], [0, 0, 1, 1], [], []>} : vector<8x48xbf16>, vector<48x192xbf16>, vector<8x192xf32> -> vector<8x192xf32>
    %148 = arith.addf %94, %147 : vector<8x192xf32>
    %cst_80 = arith.constant dense<0.000000e+00> : vector<48x8xf32>
    %149 = tpu.matmul %124, %9, %cst_80 {dimension_numbers = #tpu.dot_dimension_numbers<[1], [0], [0], [1], [0, 0, 1, 1], [], []>} : vector<48x192xbf16>, vector<192x8xbf16>, vector<48x8xf32> -> vector<48x8xf32>
    %150 = vector.extract_strided_slice %119 {offsets = [8, 0], sizes = [8, 48], strides = [1, 1]} : vector<16x48xf32> to vector<8x48xf32>
    %151 = arith.truncf %150 : vector<8x48xf32> to vector<8x48xbf16>
    %152 = vector.extract_strided_slice %122 {offsets = [8, 0], sizes = [8, 48], strides = [1, 1]} : vector<16x48xf32> to vector<8x48xf32>
    %153 = arith.truncf %152 : vector<8x48xf32> to vector<8x48xbf16>
    %154 = arith.truncf %149 : vector<48x8xf32> to vector<48x8xbf16>
    %cst_81 = arith.constant dense<0.000000e+00> : vector<8x8xf32>
    %155 = tpu.matmul %151, %154, %cst_81 {dimension_numbers = #tpu.dot_dimension_numbers<[1], [0], [0], [1], [0, 0, 1, 1], [], []>} : vector<8x48xbf16>, vector<48x8xbf16>, vector<8x8xf32> -> vector<8x8xf32>
    %cst_82 = arith.constant dense<0xFF800000> : vector<8xf32>
    %156 = vector.multi_reduction <maximumf>, %155, %cst_82 [1] : vector<8x8xf32> to vector<8xf32>
    %157 = vector.shape_cast %156 : vector<8xf32> to vector<8x1xf32>
    %158 = vector.broadcast %157 : vector<8x1xf32> to vector<8x8xf32>
    %159 = arith.subf %155, %158 : vector<8x8xf32>
    %160 = math.exp %159 : vector<8x8xf32>
    %cst_83 = arith.constant dense<0.000000e+00> : vector<8xf32>
    %161 = vector.multi_reduction <add>, %160, %cst_83 [1] : vector<8x8xf32> to vector<8xf32>
    %162 = vector.shape_cast %161 : vector<8xf32> to vector<8x1xf32>
    %163 = tpu.reciprocal %162 {approx = true} : vector<8x1xf32> -> vector<8x1xf32>
    %164 = vector.broadcast %163 : vector<8x1xf32> to vector<8x8xf32>
    %165 = arith.mulf %160, %164 : vector<8x8xf32>
    %166 = arith.truncf %165 : vector<8x8xf32> to vector<8x8xbf16>
    %cst_84 = arith.constant dense<0.000000e+00> : vector<8x48xf32>
    %167 = tpu.matmul %166, %153, %cst_84 {dimension_numbers = #tpu.dot_dimension_numbers<[1], [0], [0], [1], [0, 0, 1, 1], [], []>} : vector<8x8xbf16>, vector<8x48xbf16>, vector<8x48xf32> -> vector<8x48xf32>
    %168 = arith.truncf %167 : vector<8x48xf32> to vector<8x48xbf16>
    %cst_85 = arith.constant dense<0.000000e+00> : vector<8x192xf32>
    %169 = tpu.matmul %168, %126, %cst_85 {dimension_numbers = #tpu.dot_dimension_numbers<[1], [0], [0], [1], [0, 0, 1, 1], [], []>} : vector<8x48xbf16>, vector<48x192xbf16>, vector<8x192xf32> -> vector<8x192xf32>
    %170 = arith.addf %116, %169 : vector<8x192xf32>
    %c3 = arith.constant 3 : index
    %c0_86 = arith.constant 0 : index
    %c0_87 = arith.constant 0 : index
    %171 = vector.load %arg4[%c3, %c0_86, %c0_87] : memref<4x192x48xbf16, #tpu.memory_space<vmem>>, vector<1x192x48xbf16>
    %172 = vector.shape_cast %171 : vector<1x192x48xbf16> to vector<192x48xbf16>
    %cst_88 = arith.constant dense<0.000000e+00> : vector<16x48xf32>
    %173 = tpu.matmul %1, %172, %cst_88 {dimension_numbers = #tpu.dot_dimension_numbers<[1], [0], [0], [1], [0, 0, 1, 1], [], []>} : vector<16x192xbf16>, vector<192x48xbf16>, vector<16x48xf32> -> vector<16x48xf32>
    %c3_89 = arith.constant 3 : index
    %c0_90 = arith.constant 0 : index
    %c0_91 = arith.constant 0 : index
    %174 = vector.load %arg6[%c3_89, %c0_90, %c0_91] : memref<4x192x48xbf16, #tpu.memory_space<vmem>>, vector<1x192x48xbf16>
    %175 = vector.shape_cast %174 : vector<1x192x48xbf16> to vector<192x48xbf16>
    %cst_92 = arith.constant dense<0.000000e+00> : vector<16x48xf32>
    %176 = tpu.matmul %3, %175, %cst_92 {dimension_numbers = #tpu.dot_dimension_numbers<[1], [0], [0], [1], [0, 0, 1, 1], [], []>} : vector<16x192xbf16>, vector<192x48xbf16>, vector<16x48xf32> -> vector<16x48xf32>
    %c3_93 = arith.constant 3 : index
    %c0_94 = arith.constant 0 : index
    %c0_95 = arith.constant 0 : index
    %177 = vector.load %arg5[%c3_93, %c0_94, %c0_95] : memref<4x48x192xbf16, #tpu.memory_space<vmem>>, vector<1x48x192xbf16>
    %178 = vector.shape_cast %177 : vector<1x48x192xbf16> to vector<48x192xbf16>
    %c3_96 = arith.constant 3 : index
    %c0_97 = arith.constant 0 : index
    %c0_98 = arith.constant 0 : index
    %179 = vector.load %arg7[%c3_96, %c0_97, %c0_98] : memref<4x48x192xbf16, #tpu.memory_space<vmem>>, vector<1x48x192xbf16>
    %180 = vector.shape_cast %179 : vector<1x48x192xbf16> to vector<48x192xbf16>
    %cst_99 = arith.constant dense<0.000000e+00> : vector<48x8xf32>
    %181 = tpu.matmul %178, %6, %cst_99 {dimension_numbers = #tpu.dot_dimension_numbers<[1], [0], [0], [1], [0, 0, 1, 1], [], []>} : vector<48x192xbf16>, vector<192x8xbf16>, vector<48x8xf32> -> vector<48x8xf32>
    %182 = vector.extract_strided_slice %173 {offsets = [0, 0], sizes = [8, 48], strides = [1, 1]} : vector<16x48xf32> to vector<8x48xf32>
    %183 = arith.truncf %182 : vector<8x48xf32> to vector<8x48xbf16>
    %184 = vector.extract_strided_slice %176 {offsets = [0, 0], sizes = [8, 48], strides = [1, 1]} : vector<16x48xf32> to vector<8x48xf32>
    %185 = arith.truncf %184 : vector<8x48xf32> to vector<8x48xbf16>
    %186 = arith.truncf %181 : vector<48x8xf32> to vector<48x8xbf16>
    %cst_100 = arith.constant dense<0.000000e+00> : vector<8x8xf32>
    %187 = tpu.matmul %183, %186, %cst_100 {dimension_numbers = #tpu.dot_dimension_numbers<[1], [0], [0], [1], [0, 0, 1, 1], [], []>} : vector<8x48xbf16>, vector<48x8xbf16>, vector<8x8xf32> -> vector<8x8xf32>
    %cst_101 = arith.constant dense<0xFF800000> : vector<8xf32>
    %188 = vector.multi_reduction <maximumf>, %187, %cst_101 [1] : vector<8x8xf32> to vector<8xf32>
    %189 = vector.shape_cast %188 : vector<8xf32> to vector<8x1xf32>
    %190 = vector.broadcast %189 : vector<8x1xf32> to vector<8x8xf32>
    %191 = arith.subf %187, %190 : vector<8x8xf32>
    %192 = math.exp %191 : vector<8x8xf32>
    %cst_102 = arith.constant dense<0.000000e+00> : vector<8xf32>
    %193 = vector.multi_reduction <add>, %192, %cst_102 [1] : vector<8x8xf32> to vector<8xf32>
    %194 = vector.shape_cast %193 : vector<8xf32> to vector<8x1xf32>
    %195 = tpu.reciprocal %194 {approx = true} : vector<8x1xf32> -> vector<8x1xf32>
    %196 = vector.broadcast %195 : vector<8x1xf32> to vector<8x8xf32>
    %197 = arith.mulf %192, %196 : vector<8x8xf32>
    %198 = arith.truncf %197 : vector<8x8xf32> to vector<8x8xbf16>
    %cst_103 = arith.constant dense<0.000000e+00> : vector<8x48xf32>
    %199 = tpu.matmul %198, %185, %cst_103 {dimension_numbers = #tpu.dot_dimension_numbers<[1], [0], [0], [1], [0, 0, 1, 1], [], []>} : vector<8x8xbf16>, vector<8x48xbf16>, vector<8x48xf32> -> vector<8x48xf32>
    %200 = arith.truncf %199 : vector<8x48xf32> to vector<8x48xbf16>
    %cst_104 = arith.constant dense<0.000000e+00> : vector<8x192xf32>
    %201 = tpu.matmul %200, %180, %cst_104 {dimension_numbers = #tpu.dot_dimension_numbers<[1], [0], [0], [1], [0, 0, 1, 1], [], []>} : vector<8x48xbf16>, vector<48x192xbf16>, vector<8x192xf32> -> vector<8x192xf32>
    %202 = arith.addf %148, %201 : vector<8x192xf32>
    %cst_105 = arith.constant dense<0.000000e+00> : vector<48x8xf32>
    %203 = tpu.matmul %178, %9, %cst_105 {dimension_numbers = #tpu.dot_dimension_numbers<[1], [0], [0], [1], [0, 0, 1, 1], [], []>} : vector<48x192xbf16>, vector<192x8xbf16>, vector<48x8xf32> -> vector<48x8xf32>
    %204 = vector.extract_strided_slice %173 {offsets = [8, 0], sizes = [8, 48], strides = [1, 1]} : vector<16x48xf32> to vector<8x48xf32>
    %205 = arith.truncf %204 : vector<8x48xf32> to vector<8x48xbf16>
    %206 = vector.extract_strided_slice %176 {offsets = [8, 0], sizes = [8, 48], strides = [1, 1]} : vector<16x48xf32> to vector<8x48xf32>
    %207 = arith.truncf %206 : vector<8x48xf32> to vector<8x48xbf16>
    %208 = arith.truncf %203 : vector<48x8xf32> to vector<48x8xbf16>
    %cst_106 = arith.constant dense<0.000000e+00> : vector<8x8xf32>
    %209 = tpu.matmul %205, %208, %cst_106 {dimension_numbers = #tpu.dot_dimension_numbers<[1], [0], [0], [1], [0, 0, 1, 1], [], []>} : vector<8x48xbf16>, vector<48x8xbf16>, vector<8x8xf32> -> vector<8x8xf32>
    %cst_107 = arith.constant dense<0xFF800000> : vector<8xf32>
    %210 = vector.multi_reduction <maximumf>, %209, %cst_107 [1] : vector<8x8xf32> to vector<8xf32>
    %211 = vector.shape_cast %210 : vector<8xf32> to vector<8x1xf32>
    %212 = vector.broadcast %211 : vector<8x1xf32> to vector<8x8xf32>
    %213 = arith.subf %209, %212 : vector<8x8xf32>
    %214 = math.exp %213 : vector<8x8xf32>
    %cst_108 = arith.constant dense<0.000000e+00> : vector<8xf32>
    %215 = vector.multi_reduction <add>, %214, %cst_108 [1] : vector<8x8xf32> to vector<8xf32>
    %216 = vector.shape_cast %215 : vector<8xf32> to vector<8x1xf32>
    %217 = tpu.reciprocal %216 {approx = true} : vector<8x1xf32> -> vector<8x1xf32>
    %218 = vector.broadcast %217 : vector<8x1xf32> to vector<8x8xf32>
    %219 = arith.mulf %214, %218 : vector<8x8xf32>
    %220 = arith.truncf %219 : vector<8x8xf32> to vector<8x8xbf16>
    %cst_109 = arith.constant dense<0.000000e+00> : vector<8x48xf32>
    %221 = tpu.matmul %220, %207, %cst_109 {dimension_numbers = #tpu.dot_dimension_numbers<[1], [0], [0], [1], [0, 0, 1, 1], [], []>} : vector<8x8xbf16>, vector<8x48xbf16>, vector<8x48xf32> -> vector<8x48xf32>
    %222 = arith.truncf %221 : vector<8x48xf32> to vector<8x48xbf16>
    %cst_110 = arith.constant dense<0.000000e+00> : vector<8x192xf32>
    %223 = tpu.matmul %222, %180, %cst_110 {dimension_numbers = #tpu.dot_dimension_numbers<[1], [0], [0], [1], [0, 0, 1, 1], [], []>} : vector<8x48xbf16>, vector<48x192xbf16>, vector<8x192xf32> -> vector<8x192xf32>
    %224 = arith.addf %170, %223 : vector<8x192xf32>
    %225 = vector.broadcast %10 : vector<1x192xf32> to vector<8x192xf32>
    %226 = arith.addf %202, %225 : vector<8x192xf32>
    %c0_111 = arith.constant 0 : index
    %c0_112 = arith.constant 0 : index
    %227 = vector.load %arg9[%c0_111, %c0_112] : memref<16x192xf32, #tpu.memory_space<vmem>>, vector<8x192xf32>
    tpu.vector_store %arg9[%c0_111, %c0_112], %226 {strides = array<i32>} : memref<16x192xf32, #tpu.memory_space<vmem>>, vector<8x192xf32>,
    %228 = vector.broadcast %10 : vector<1x192xf32> to vector<8x192xf32>
    %229 = arith.addf %224, %228 : vector<8x192xf32>
    %c8 = arith.constant 8 : index
    %c0_113 = arith.constant 0 : index
    %230 = vector.load %arg9[%c8, %c0_113] : memref<16x192xf32, #tpu.memory_space<vmem>>, vector<8x192xf32>
    tpu.vector_store %arg9[%c8, %c0_113], %229 {strides = array<i32>} : memref<16x192xf32, #tpu.memory_space<vmem>>, vector<8x192xf32>,
    return
  }
  func.func @transform_0(%arg0: i32) -> (i32, i32) {
    %c0_i32 = arith.constant 0 : i32
    %c0_i32_0 = arith.constant 0 : i32
    return %arg0, %c0_i32 : i32, i32
  }
  func.func @transform_1(%arg0: i32) -> (i32, i32) {
    %c0_i32 = arith.constant 0 : i32
    %c0_i32_0 = arith.constant 0 : i32
    return %arg0, %c0_i32 : i32, i32
  }
  func.func @transform_2(%arg0: i32) -> (i32, i32, i32) {
    %c0_i32 = arith.constant 0 : i32
    %c0_i32_0 = arith.constant 0 : i32
    %c0_i32_1 = arith.constant 0 : i32
    return %arg0, %c0_i32, %c0_i32_0 : i32, i32, i32
  }
  func.func @transform_3(%arg0: i32) -> (i32, i32, i32) {
    %c0_i32 = arith.constant 0 : i32
    %c0_i32_0 = arith.constant 0 : i32
    %c0_i32_1 = arith.constant 0 : i32
    %c0_i32_2 = arith.constant 0 : i32
    return %c0_i32, %c0_i32_0, %c0_i32_1 : i32, i32, i32
  }
  func.func @transform_4(%arg0: i32) -> (i32, i32, i32) {
    %c0_i32 = arith.constant 0 : i32
    %c0_i32_0 = arith.constant 0 : i32
    %c0_i32_1 = arith.constant 0 : i32
    %c0_i32_2 = arith.constant 0 : i32
    return %c0_i32, %c0_i32_0, %c0_i32_1 : i32, i32, i32
  }
  func.func @transform_5(%arg0: i32) -> (i32, i32, i32) {
    %c0_i32 = arith.constant 0 : i32
    %c0_i32_0 = arith.constant 0 : i32
    %c0_i32_1 = arith.constant 0 : i32
    %c0_i32_2 = arith.constant 0 : i32
    return %c0_i32, %c0_i32_0, %c0_i32_1 : i32, i32, i32
  }
  func.func @transform_6(%arg0: i32) -> (i32, i32, i32) {
    %c0_i32 = arith.constant 0 : i32
    %c0_i32_0 = arith.constant 0 : i32
    %c0_i32_1 = arith.constant 0 : i32
    %c0_i32_2 = arith.constant 0 : i32
    return %c0_i32, %c0_i32_0, %c0_i32_1 : i32, i32, i32
  }
  func.func @transform_7(%arg0: i32) -> (i32, i32) {
    %c0_i32 = arith.constant 0 : i32
    %c0_i32_0 = arith.constant 0 : i32
    %c0_i32_1 = arith.constant 0 : i32
    return %c0_i32, %c0_i32_0 : i32, i32
  }
  func.func @transform_8(%arg0: i32) -> (i32, i32) {
    %c0_i32 = arith.constant 0 : i32
    %c0_i32_0 = arith.constant 0 : i32
    return %arg0, %c0_i32 : i32, i32
  }
}

</mosaic_0001>

<bundles_post_ra>
// kernel: a_call__.1
= control target key start
LH: loop header
LB: loop body
LE: loop exit
PB: predicated region body
PF: predicated region fallthrough
CT: control target
= control target key end

     0   :  { %13 = vsyncpa [#allocation3], 0  ;;  %s4466_s0 = inlined_call_operand.hbm [shape: f32[16,192], index: 0, kind: input, shape index: {}]   ;;  %s4467_s1 = inlined_call_operand.vmem [shape: f32[16,192], index: 1, kind: input, shape index: {}]   ;;  %s4468_s2 = inlined_call_operand.vmem [shape: f32[2,192,8], index: 2, kind: input, shape index: {}]   ;;  %s4469_s3 = inlined_call_operand.hbm [shape: bf16[4,192,48], index: 3, kind: input, shape index: {}]   ;;  %s4470_s4 = inlined_call_operand.hbm [shape: bf16[4,48,192], index: 4, kind: input, shape index: {}]   ;;  %s4471_s5 = inlined_call_operand.vmem [shape: bf16[4,192,48], index: 5, kind: input, shape index: {}]   ;;  %s4472_s6 = inlined_call_operand.hbm [shape: bf16[4,48,192], index: 6, kind: input, shape index: {}]   ;;  %s4473_s7 = inlined_call_operand.vmem [shape: f32[1,192], index: 7, kind: input, shape index: {}]   ;;  %s4474_s8 = inlined_call_operand.hbm [shape: f32[16,192], index: 8, kind: output, shape index: {}]  }
   0x1   :  { %14 = vsyncpa [#allocation6], 0 }
   0x2   :  { %15 = vsyncpa [#allocation9], 0  ;;  %s38_s29 = sshll.u32 %s4469_s3, 4  ;;  %s39_s29 = int_to_ptr.hbm [resolvable:$true] %s38_s29 }
   0x3   :  { %16 = vsyncpa [#allocation4], 0  ;;  %s3639_s30 = smov [#allocation5]   ;;  %s21_s12 = sshll.u32 %s4466_s0, 4  ;;  %s22_s12 = int_to_ptr.hbm [resolvable:$true] %s21_s12 }
   0x4   :  { %s40_s9 = sshll.u32 %s3639_s30, 4  ;;  %s3640_s13 = smov 64   ;;  %s41_s9 = int_to_ptr.vmem [resolvable:$true] %s40_s9 }
   0x5   :  { %s3641_s14 = smov 4   ;;  %s3642_s15 = smov [#allocation2]  }
   0x6   :  { %46 = dma.hbm_to_vmem [thread:$0]  %s39_s29, 6144, %s41_s9, [#allocation6], %s3640_s13, %s3640_s13, %s3641_s14  }
   0x7   :  { %s23_s16 = sshll.u32 %s3642_s15, 4  ;;  %s3643_s17 = smov 256   ;;  %s24_s16 = int_to_ptr.vmem [resolvable:$true] %s23_s16 }
   0x8   :  { %s3644_s18 = smov 16   ;;  %s51_s20 = sshll.u32 %s4470_s4, 4  ;;  %s52_s20 = int_to_ptr.hbm [resolvable:$true] %s51_s20 }
   0x9   :  { %29 = dma.hbm_to_vmem [thread:$0]  %s22_s12, 512, %s24_s16, [#allocation3], %s3643_s17, %s3643_s17, %s3644_s18  }
   0xa   :  { %s3645_s21 = smov [#allocation7]   ;;  %s66_s24 = sshll.u32 %s4472_s6, 4  ;;  %s67_s24 = int_to_ptr.hbm [resolvable:$true] %s66_s24 }
   0xb   :  { %s53_s0 = sshll.u32 %s3645_s21, 4  ;;  %s3646_s25 = smov 128   ;;  %s54_s0 = int_to_ptr.vmem [resolvable:$true] %s53_s0 }
   0xc   :  { %s3647_s26 = smov 8   ;;  %s3648_s27 = smov [#allocation8]  }
   0xd   :  { %59 = dma.hbm_to_vmem [thread:$0]  %s52_s20, 3072, %s54_s0, [#allocation6], %s3646_s25, %s3646_s25, %s3647_s26  }
   0xe   :  { %s68_s28 = sshll.u32 %s3648_s27, 4  ;;  %s69_s28 = int_to_ptr.vmem [resolvable:$true] %s68_s28 }
   0xf   :  { %74 = dma.hbm_to_vmem [thread:$0]  %s67_s24, 3072, %s69_s28, [#allocation9], %s3646_s25, %s3646_s25, %s3647_s26  }
  0x10   :  { %3631 = dma.done.wait [#allocation3], 512  }
  0x11   :  { %3632 = vsyncadd [#allocation3], 4294966784 }
  0x12   :  { %3633 = dma.done.wait [#allocation6], 9216  }
  0x13   :  { %3634 = vsyncadd [#allocation6], 4294958080 }
  0x14   :  { %3635 = dma.done.wait [#allocation9], 3072  }
  0x15   :  { %3636 = vsyncadd [#allocation9], 4294964224  ;;  %v3331_v0 = vld [vmem:[#allocation5 + $0x38] sm:$0xff]  ;;  %v3330_v4 = vld [vmem:[#allocation5 + $0x30] sm:$0xff]  ;;  %vm276_vm0 = vcmask 523264   ;;  %vm569_vm1 = vcmask 1043456  }
  0x16   :  { %v3335_v1 = vld [vmem:[#allocation5 + $0x58] sm:$0xff]  ;;  %280 = vmatpush.bf16.msra.mxu0 %v3331_v0  ;;  %v3334_v5 = vld [vmem:[#allocation5 + $0x50] sm:$0xff]  ;;  %v3329_v8 = vld [vmem:[#allocation5 + $0x28] sm:$0xff]  ;;  %vm536_vm2 = vcmask 392192   ;;  %vm553_vm3 = vcmask 64512   ;;  %s2573_s30 = sshll.u32 %s4474_s8, 4  ;;  %s2574_s30 = int_to_ptr.hbm [resolvable:$true] %s2573_s30 }
  0x17   :  { %v3343_v2 = vld [vmem:[%s4471_s5 + $0x38] sm:$0xff]  ;;  %298 = vmatpush.bf16.msra.mxu1 %v3335_v1  ;;  %v3342_v6 = vld [vmem:[%s4471_s5 + $0x30] sm:$0xff]  ;;  %v3333_v9 = vld [vmem:[#allocation5 + $0x48] sm:$0xff] }
  0x18   :  { %v3347_v3 = vld [vmem:[%s4471_s5 + $0x58] sm:$0xff]  ;;  %407 = vmatpush.bf16.msra.mxu2 %v3343_v2  ;;  %v3346_v7 = vld [vmem:[%s4471_s5 + $0x50] sm:$0xff]  ;;  %v3341_v10 = vld [vmem:[%s4471_s5 + $0x28] sm:$0xff] }
  0x19   :  { %425 = vmatpush.bf16.msra.mxu3 %v3347_v3  ;;  %v3345_v11 = vld [vmem:[%s4471_s5 + $0x48] sm:$0xff]  ;;  %v3328_v12 = vld [vmem:[#allocation5 + $0x20] sm:$0xff]  ;;  %v120_v14 = vld [vmem:[%s4468_s2 + $0x70] sm:$0xff] }
  0x1a   :  { %281 = vmatpush.bf16.msra.mxu0 %v3330_v4  ;;  %v3332_v13 = vld [vmem:[#allocation5 + $0x40] sm:$0xff]  ;;  %v121_v15 = vld [vmem:[%s4468_s2 + $0x78] sm:$0xff]  ;;  %v128_v16 = vld [vmem:[%s4468_s2 + $0xb0] sm:$0xff] }
  0x1b   :  { %299 = vmatpush.bf16.msra.mxu1 %v3334_v5  ;;  %v129_v17 = vld [vmem:[%s4468_s2 + $0xb8] sm:$0xff]  ;;  %v3340_v18 = vld [vmem:[%s4471_s5 + $0x20] sm:$0xff]  ;;  %v95_v19 = vld [vmem:[#allocation2 + $0x8] sm:$0xff]  ;;  %v3752_v24 = vpack.c.bf16 %v121_v15, %v120_v14 }
  0x1c   :  { %408 = vmatpush.bf16.msra.mxu2 %v3342_v6  ;;  %v97_v20 = vld [vmem:[#allocation2 + $0x18] sm:$0xff]  ;;  %v3344_v21 = vld [vmem:[%s4471_s5 + $0x40] sm:$0xff]  ;;  %v101_v22 = vld [vmem:[%s4467_s1 + $0x8] sm:$0xff]  ;;  %v3754_v25 = vpack.c.bf16 %v129_v17, %v128_v16 }
  0x1d   :  { %426 = vmatpush.bf16.msra.mxu3 %v3346_v7  ;;  %v103_v23 = vld [vmem:[%s4467_s1 + $0x18] sm:$0xff]  ;;  %v118_v26 = vld [vmem:[%s4468_s2 + $0x60] sm:$0xff]  ;;  %v119_v27 = vld [vmem:[%s4468_s2 + $0x68] sm:$0xff]  ;;  %v3762_v28 = vpack.c.bf16 %v97_v20, %v95_v19 }
  0x1e   :  { %282 = vmatpush.bf16.msra.mxu0 %v3329_v8  ;;  %v126_v29 = vld [vmem:[%s4468_s2 + $0xa0] sm:$0xff]  ;;  %v127_v30 = vld [vmem:[%s4468_s2 + $0xa8] sm:$0xff]  ;;  %v3770_v31 = vpack.c.bf16 %v103_v23, %v101_v22  ;;  %v3327_v32 = vld [vmem:[#allocation5 + $0x18] sm:$0xff]  ;;  %v3777_v34 = vpack.c.bf16 %v119_v27, %v118_v26 }
  0x1f   :  { %300 = vmatpush.bf16.msra.mxu1 %v3333_v9  ;;  %v3339_v33 = vld [vmem:[%s4471_s5 + $0x18] sm:$0xff]  ;;  %v3779_v35 = vpack.c.bf16 %v127_v30, %v126_v29  ;;  %v116_v36 = vld [vmem:[%s4468_s2 + $0x50] sm:$0xff]  ;;  %v114_v44 = vld [vmem:[%s4468_s2 + $0x40] sm:$0xff] }
  0x20   :  { %409 = vmatpush.bf16.msra.mxu2 %v3341_v10  ;;  %v117_v37 = vld [vmem:[%s4468_s2 + $0x58] sm:$0xff]  ;;  %v124_v38 = vld [vmem:[%s4468_s2 + $0x90] sm:$0xff]  ;;  %v115_v45 = vld [vmem:[%s4468_s2 + $0x48] sm:$0xff] }
  0x21   :  { %427 = vmatpush.bf16.msra.mxu3 %v3345_v11  ;;  %v125_v39 = vld [vmem:[%s4468_s2 + $0x98] sm:$0xff]  ;;  %v3326_v40 = vld [vmem:[#allocation5 + $0x10] sm:$0xff]  ;;  %v3802_v42 = vpack.c.bf16 %v117_v37, %v116_v36  ;;  %v122_v46 = vld [vmem:[%s4468_s2 + $0x80] sm:$0xff]  ;;  %v3823_v50 = vpack.c.bf16 %v115_v45, %v114_v44 }
  0x22   :  { %283 = vmatpush.bf16.msra.mxu0 %v3328_v12  ;;  %v3338_v41 = vld [vmem:[%s4471_s5 + $0x10] sm:$0xff]  ;;  %v3804_v43 = vpack.c.bf16 %v125_v39, %v124_v38  ;;  %v123_v47 = vld [vmem:[%s4468_s2 + $0x88] sm:$0xff]  ;;  %v3324_v51 = vld [vmem:[#allocation5] sm:$0xff] }
  0x23   :  { %301 = vmatpush.bf16.msra.mxu1 %v3332_v13  ;;  %v3325_v48 = vld [vmem:[#allocation5 + $0x8] sm:$0xff]  ;;  %v3825_v52 = vpack.c.bf16 %v123_v47, %v122_v46  ;;  %v3336_v53 = vld [vmem:[%s4471_s5] sm:$0xff]  ;;  %v112_v54 = vld [vmem:[%s4468_s2 + $0x30] sm:$0xff] }
  0x24   :  { %410 = vmatpush.bf16.msra.mxu2 %v3340_v18  ;;  %v3337_v49 = vld [vmem:[%s4471_s5 + $0x8] sm:$0xff]  ;;  %v113_v55 = vld [vmem:[%s4468_s2 + $0x38] sm:$0xff]  ;;  %v94_v56 = vld [vmem:[#allocation2] sm:$0xff] }
  0x25   :  { %428 = vmatpush.bf16.msra.mxu3 %v3344_v21  ;;  %v96_v57 = vld [vmem:[#allocation2 + $0x10] sm:$0xff]  ;;  %v100_v58 = vld [vmem:[%s4467_s1] sm:$0xff]  ;;  %v2714_v61 = vld [vmem:[#allocation7 + $0x8] sm:$0xf0]  ;;  %v3844_v62 = vpack.c.bf16 %v113_v55, %v112_v54 }
  0x26   :  { %2660 = vmatmul.msk.bf16.vlgmr.msra.gmra.mxu1 %vm276_vm0, %v3762_v28  ;;  %284 = vmatpush.bf16.msra.mxu0 %v3327_v32  ;;  %v102_v59 = vld [vmem:[%s4467_s1 + $0x10] sm:$0xff]  ;;  %v3348_v60 = vld [vmem:[#allocation7 + $0x4] sm:$0xf]  ;;  %v3846_v63 = vpack.c.bf16 %v96_v57, %v94_v56  ;;  %v111_v1 = vld [vmem:[%s4468_s2 + $0x28] sm:$0xff] }
  0x27   :  { %483 = vmatpush.bf16.msrb.mxu1 %v3752_v24  ;;  %v110_v0 = vld [vmem:[%s4468_s2 + $0x20] sm:$0xff]  ;;  %v3854_v2 = vpack.c.bf16 %v102_v59, %v100_v58  ;;  %v3856_v3 = vor.u32 %v3348_v60, %v2714_v61  ;;  %v108_v5 = vld [vmem:[%s4468_s2 + $0x10] sm:$0xff]  ;;  %v109_v6 = vld [vmem:[%s4468_s2 + $0x18] sm:$0xff] }
  0x28   :  { %2709 = vmatmul.msk.bf16.vlgmr.msra.gmra.mxu3 %vm276_vm0, %v3770_v31  ;;  %411 = vmatpush.bf16.msra.mxu2 %v3339_v33  ;;  %v3859_v4 = vpack.c.bf16 %v111_v1, %v110_v0  ;;  %v3872_v7 = vpack.c.bf16 %v109_v6, %v108_v5  ;;  %v106_v8 = vld [vmem:[%s4468_s2] sm:$0xff]  ;;  %v107_v9 = vld [vmem:[%s4468_s2 + $0x8] sm:$0xff]  ;;  %v3350_v14 = vld [vmem:[#allocation7 + $0x14] sm:$0xf] }
  0x29   :  { %511 = vmatpush.bf16.msrb.mxu3 %v3754_v25  ;;  %v3881_v10 = vpack.c.bf16 %v107_v9, %v106_v8  ;;  %v2712_v11 = vld [vmem:[#allocation7] sm:$0xf]  ;;  %v3349_v12 = vld [vmem:[#allocation7 + $0x4] sm:$0xf0]  ;;  %v2722_v15 = vld [vmem:[#allocation7 + $0x18] sm:$0xf0] }
  0x2a   :  { %285 = vmatpush.bf16.msra.mxu0 %v3326_v40  ;;  %v3883_v13 = vor.u32 %v3349_v12, %v2712_v11  ;;  %v3886_v16 = vor.u32 %v3350_v14, %v2722_v15  ;;  %v2720_v17 = vld [vmem:[#allocation7 + $0x10] sm:$0xf]  ;;  %v3351_v18 = vld [vmem:[#allocation7 + $0x14] sm:$0xf0]  ;;  %v3352_v20 = vld [vmem:[#allocation7 + $0x24] sm:$0xf] }
  0x2b   :  { %484 = vmatpush.bf16.msrb.mxu1 %v3777_v34  ;;  %v3891_v19 = vor.u32 %v3351_v18, %v2720_v17  ;;  %v2730_v21 = vld [vmem:[#allocation7 + $0x28] sm:$0xf0]  ;;  %v2728_v23 = vld [vmem:[#allocation7 + $0x20] sm:$0xf]  ;;  %v3353_v26 = vld [vmem:[#allocation7 + $0x24] sm:$0xf0] }
  0x2c   :  { %412 = vmatpush.bf16.msra.mxu2 %v3338_v41  ;;  %v3893_v22 = vor.u32 %v3352_v20, %v2730_v21  ;;  %v3898_v27 = vor.u32 %v3353_v26, %v2728_v23  ;;  %v2602_v21 = vld [vmem:[%s4468_s2 + $0x130] sm:$0xff]  ;;  %v2603_v23 = vld [vmem:[%s4468_s2 + $0x138] sm:$0xff]  ;;  %v2600_v26 = vld [vmem:[%s4468_s2 + $0x120] sm:$0xff] }
  0x2d   :  { %512 = vmatpush.bf16.msrb.mxu3 %v3779_v35 }
  0x2e   :  { %286 = vmatpush.bf16.msra.mxu0 %v3325_v48 }
  0x2f   :  { %485 = vmatpush.bf16.msrb.mxu1 %v3802_v42 }
  0x30   :  { %413 = vmatpush.bf16.msra.mxu2 %v3337_v49 }
  0x31   :  { %513 = vmatpush.bf16.msrb.mxu3 %v3804_v43 }
  0x32   :  { %287 = vmatpush.bf16.msra.mxu0 %v3324_v51 }
  0x33   :  { %486 = vmatpush.bf16.msrb.mxu1 %v3823_v50 }
  0x34   :  { %414 = vmatpush.bf16.msra.mxu2 %v3336_v53 }
  0x35   :  { %514 = vmatpush.bf16.msrb.mxu3 %v3825_v52  ;;  %288 = vmatmul.bf16.vlgmr.msra.gmra.mxu0 %v3846_v63 }
  0x37   :  { %487 = vmatpush.bf16.msrb.mxu1 %v3844_v62  ;;  %415 = vmatmul.bf16.vlgmr.msra.gmra.mxu2 %v3854_v2 }
  0x38   :  { %2734 = vmatmul.msk.bf16.vlgmr.msrb.gmra.mxu3 %vm276_vm0, %v3856_v3 }
  0x3b   :  { %488 = vmatpush.bf16.msrb.mxu1 %v3859_v4 }
  0x3f   :  { %489 = vmatpush.bf16.msrb.mxu1 %v3872_v7 }
  0x43   :  { %490 = vmatpush.bf16.msrb.mxu1 %v3881_v10 }
  0x46   :  { %491 = vmatmul.bf16.vlgmr.msrb.gmra.mxu1 %v3883_v13 }
  0x48   :  { %2735 = vmatmul.msk.bf16.gmra.mxu3 %vm276_vm0, %v3886_v16 }
  0x56   :  { %496 = vmatmul.bf16.gmra.mxu1 %v3891_v19 }
  0x58   :  { %2736 = vmatmul.msk.bf16.gmra.mxu3 %vm276_vm0, %v3893_v22 }
  0x66   :  { %501 = vmatmul.bf16.gmra.mxu1 %v3898_v27 }
  0xa3   :  { %v303_v30 = vpop.f32.mrf.mxu1 }
  0xab   :  { %v430_v29 = vpop.f32.mrf.mxu3  ;;  %v3901_v33 = vpop.f32.mrf.mxu1 }
  0xb2   :  { %v289_v6 = vpop.f32.mrf.mxu0 }
  0xb3   :  { %v432_v32 = vpop.f32.mrf.mxu3  ;;  %v304_v12 = vadd.f32 %v303_v30, %v289_v6  ;;  %v2601_v30 = vld [vmem:[%s4468_s2 + $0x128] sm:$0xff]  ;;  %v2606_v6 = vld [vmem:[%s4468_s2 + $0x150] sm:$0xff] }
  0xb5   :  { %v531_v15 = vpack.c.bf16 %v304_v12, %v304_v12  ;;  %v2589_v12 = vld [vmem:[%s4468_s2 + $0xc8] sm:$0xff] }
  0xba   :  { %v416_v36 = vpop.f32.mrf.mxu2 }
  0xbb   :  { %v516_v37 = vpop.f32.mrf.mxu3  ;;  %v431_v38 = vadd.f32 %v430_v29, %v416_v36  ;;  %v3916_v29 = vpack.c.bf16 %v2603_v23, %v2602_v21 }
  0xbd   :  { %v532_v39 = vpack.c.bf16 %v431_v38, %v431_v38  ;;  %587 = vmatpush.bf16.msrb.mxu0 %v3916_v29 }
  0xbf   :  { %v571_v40 = vsel %vm569_vm1, %v532_v39, 0 }
  0xc0   :  { %580 = vmatpush.bf16.msrb.mxu2 %v571_v40 }
  0xc2   :  { %v418_v44 = vpop.f32.mrf.mxu2 }
  0xc3   :  { %v492_v41 = vpop.f32.mrf.mxu1  ;;  %v518_v45 = vpop.f32.mrf.mxu3  ;;  %v433_v46 = vadd.f32 %v432_v32, %v418_v44  ;;  %v3922_v32 = vpack.c.bf16 %v2601_v30, %v2600_v26  ;;  %v2599_v44 = vld [vmem:[%s4468_s2 + $0x118] sm:$0xff] }
  0xc4   :  { %v517_v11 = vadd.f32 %v516_v37, %v492_v41  ;;  %v2598_v41 = vld [vmem:[%s4468_s2 + $0x110] sm:$0xff] }
  0xc5   :  { %v636_v47 = vpack.c.bf16 %v433_v46, %v433_v46  ;;  %588 = vmatpush.bf16.msrb.mxu0 %v3922_v32  ;;  %v2596_v46 = vld [vmem:[%s4468_s2 + $0x100] sm:$0xff] }
  0xc7   :  { %v672_v48 = vsel %vm569_vm1, %v636_v47, 0  ;;  %v2597_v47 = vld [vmem:[%s4468_s2 + $0x108] sm:$0xff] }
  0xc8   :  { %681 = vmatpush.bf16.msra.mxu1 %v672_v48  ;;  %v3941_v48 = vpack.c.bf16 %v2597_v47, %v2596_v46 }
  0xcb   :  { %v494_v49 = vpop.f32.mrf.mxu1  ;;  %v521_v51 = vpop.f32.mrf.mxu3 }
  0xcc   :  { %v519_v8 = vadd.f32 %v518_v45, %v494_v49  ;;  %v3932_v45 = vpack.c.bf16 %v2599_v44, %v2598_v41  ;;  %v2594_v49 = vld [vmem:[%s4468_s2 + $0xf0] sm:$0xff] }
  0xce   :  { %v533_v14 = vpack.c.bf16 %v519_v8, %v517_v11  ;;  %589 = vmatpush.bf16.msrb.mxu0 %v3932_v45  ;;  %v2607_v8 = vld [vmem:[%s4468_s2 + $0x158] sm:$0xff]  ;;  %v2588_v11 = vld [vmem:[%s4468_s2 + $0xc0] sm:$0xff] }
  0xd2   :  { %590 = vmatpush.bf16.msrb.mxu0 %v3941_v48 }
  0xd3   :  { %v497_v53 = vpop.f32.mrf.mxu1  ;;  %v523_v54 = vpop.f32.mrf.mxu3 }
  0xd4   :  { %v522_v5 = vadd.f32 %v521_v51, %v497_v53  ;;  %v2595_v51 = vld [vmem:[%s4468_s2 + $0xf8] sm:$0xff] }
  0xd5   :  { %v3950_v53 = vpack.c.bf16 %v2595_v51, %v2594_v49 }
  0xd7   :  { %591 = vmatpush.bf16.msrb.mxu0 %v3950_v53 }
  0xdb   :  { %v499_v55 = vpop.f32.mrf.mxu1  ;;  %v526_v56 = vpop.f32.mrf.mxu3 }
  0xdc   :  { %v524_v0 = vadd.f32 %v523_v54, %v499_v55  ;;  %v2610_v54 = vld [vmem:[%s4468_s2 + $0x170] sm:$0xff]  ;;  %v2611_v55 = vld [vmem:[%s4468_s2 + $0x178] sm:$0xff] }
  0xde   :  { %v534_v9 = vpack.c.bf16 %v524_v0, %v522_v5  ;;  %v2590_v0 = vld [vmem:[%s4468_s2 + $0xd0] sm:$0xff] }
  0xe3   :  { %v502_v57 = vpop.f32.mrf.mxu1  ;;  %v528_v58 = vpop.f32.mrf.mxu3 }
  0xe4   :  { %v527_v60 = vadd.f32 %v526_v56, %v502_v57  ;;  %v3959_v56 = vpack.c.bf16 %v2611_v55, %v2610_v54  ;;  %v2592_v57 = vld [vmem:[%s4468_s2 + $0xe0] sm:$0xff] }
  0xe6   :  { %615 = vmatpush.bf16.msra.mxu2 %v3959_v56 }
  0xeb   :  { %v504_v59 = vpop.f32.mrf.mxu1 }
  0xec   :  { %v529_v61 = vadd.f32 %v528_v58, %v504_v59  ;;  %v2593_v58 = vld [vmem:[%s4468_s2 + $0xe8] sm:$0xff]  ;;  %v2608_v59 = vld [vmem:[%s4468_s2 + $0x160] sm:$0xff] }
  0xee   :  { %v535_v1 = vpack.c.bf16 %v529_v61, %v527_v60  ;;  %v3971_v60 = vpack.c.bf16 %v2593_v58, %v2592_v57  ;;  %v2609_v61 = vld [vmem:[%s4468_s2 + $0x168] sm:$0xff] }
  0xef   :  { %v3982_v5 = vpack.c.bf16 %v2609_v61, %v2608_v59 }
  0xf0   :  { %545 = vmatpush.bf16.msra.mxu3 %v535_v1  ;;  %v2591_v1 = vld [vmem:[%s4468_s2 + $0xd8] sm:$0xff]  ;;  %592 = vmatpush.bf16.msrb.mxu0 %v3971_v60 }
  0xf1   :  { %616 = vmatpush.bf16.msra.mxu2 %v3982_v5 }
  0xf4   :  { %546 = vmatpush.bf16.msra.mxu3 %v534_v9  ;;  %v3991_v9 = vpack.c.bf16 %v2591_v1, %v2590_v0 }
  0xf6   :  { %593 = vmatpush.bf16.msrb.mxu0 %v3991_v9 }
  0xf8   :  { %547 = vmatpush.bf16.msra.mxu3 %v533_v14  ;;  %v4000_v14 = vpack.c.bf16 %v2607_v8, %v2606_v6 }
  0xfa   :  { %617 = vmatpush.bf16.msra.mxu2 %v4000_v14 }
  0xfb   :  { %2737 = vmatmul.msk.bf16.vlgmr.msra.gmra.mxu3 %vm536_vm2, %v531_v15  ;;  %v2604_v15 = vld [vmem:[%s4468_s2 + $0x140] sm:$0xff] }
 0x17e   :  { %v549_v17 = vpop.f32.mrf.mxu3 }
 0x17f   :  { %v554_v18 = vsel %vm553_vm3, %v549_v17, -inf }
 0x180   :  { %555 = vmax.xlane.f32.xlu0 %v554_v18  ;;  %v4009_v18 = vpack.c.bf16 %v2589_v12, %v2588_v11 }
 0x182   :  { %594 = vmatpush.bf16.msrb.mxu0 %v4009_v18 }
 0x185   :  { %595 = vmatmul.bf16.vlgmr.msrb.gmra.mxu0 %v3883_v13  ;;  %v291_v13 = vpop.f32.mrf.mxu0 }
 0x186   :  { %v551_v20 = vpop.f32.mrf.mxu3  ;;  %v306_v0 = vadd.f32 %v3901_v33, %v291_v13  ;;  %v3379_v33 = vld [vmem:[%s4471_s5 + $0x98] sm:$0xff]  ;;  %v3364_v13 = vld [vmem:[#allocation5 + $0x80] sm:$0xff] }
 0x187   :  { %910 = vmatpush.bf16.msra.mxu0 %v3379_v33  ;;  %v2884_v33 = vld [vmem:[#allocation7 + $0x50] sm:$0xf] }
 0x188   :  { %v635_v6 = vpack.c.bf16 %v306_v0, %v306_v0  ;;  %v2868_v0 = vld [vmem:[#allocation7 + $0x30] sm:$0xf] }
 0x195   :  { %600 = vmatmul.bf16.gmra.mxu0 %v3891_v19 }
 0x1a5   :  { %605 = vmatmul.bf16.gmra.mxu0 %v3898_v27 }
 0x1f3   :  { %v556_v36 = vpop.xlane.xlu0 %555 }
 0x1f4   :  { %v557_v37 = vsub.f32 %v549_v17, %v556_v36  ;;  %v2605_v17 = vld [vmem:[%s4468_s2 + $0x148] sm:$0xff] }
 0x1f5   :  { %v4012_v20 = vpack.c.bf16 %v2605_v17, %v2604_v15  ;;  %v3367_v15 = vld [vmem:[#allocation5 + $0x98] sm:$0xff] }
 0x1f6   :  { %v558_v38 = vmul.f32 1.442695, %v557_v37  ;;  %v3371_v17 = vld [vmem:[#allocation5 + $0xb8] sm:$0xff] }
 0x1f7   :  { %618 = vmatpush.bf16.msra.mxu2 %v4012_v20 }
 0x1f8   :  { %3479 = vpow2.f32 %v558_v38 }
 0x1fe   :  { %v3480_v39 = vpop.eup %3479 }
 0x1ff   :  { %v560_v40 = vsel %vm553_vm3, %v3480_v39, 0.0 }
 0x200   :  { %561 = vadd.xlane.f32.xlu0 %v560_v40 }
 0x202   :  { %v596_v37 = vpop.f32.mrf.mxu0 }
 0x273   :  { %v562_v21 = vpop.xlane.xlu0 %561 }
 0x274   :  { %3481 = vrcp.f32 %v562_v21  ;;  %v3366_v21 = vld [vmem:[#allocation5 + $0x90] sm:$0xff] }
 0x27a   :  { %v3482_v23 = vpop.eup %3481 }
 0x27b   :  { %v564_v26 = vmul.f32 %v3482_v23, %v3480_v39  ;;  %v598_v39 = vpop.f32.mrf.mxu0  ;;  %v3370_v23 = vld [vmem:[#allocation5 + $0xb0] sm:$0xff] }
 0x27d   :  { %v565_v30 = vpack.c.bf16 %v564_v26, %v564_v26  ;;  %v3365_v26 = vld [vmem:[#allocation5 + $0x88] sm:$0xff] }
 0x27f   :  { %2738 = vmatmul.msk.bf16.vlgmr.msrb.gmra.mxu2 %vm553_vm3, %v565_v30  ;;  %v3369_v30 = vld [vmem:[#allocation5 + $0xa8] sm:$0xff] }
 0x280   :  { %785 = vmatpush.bf16.msrb.mxu2 %v3367_v15 }
 0x283   :  { %v601_v41 = vpop.f32.mrf.mxu0 }
 0x284   :  { %786 = vmatpush.bf16.msrb.mxu2 %v3366_v21  ;;  %v3387_v21 = vld [vmem:[#allocation7 + $0x44] sm:$0xf0] }
 0x288   :  { %787 = vmatpush.bf16.msrb.mxu2 %v3365_v26  ;;  %v3389_v26 = vld [vmem:[#allocation7 + $0x54] sm:$0xf0] }
 0x28b   :  { %v603_v27 = vpop.f32.mrf.mxu0 }
 0x28c   :  { %788 = vmatpush.bf16.msrb.mxu2 %v3364_v13  ;;  %v3384_v13 = vld [vmem:[#allocation7 + $0x34] sm:$0xf] }
 0x28f   :  { %2739 = vmatmul.msk.bf16.vlgmr.msra.gmra.mxu2 %vm276_vm0, %v3856_v3 }
 0x293   :  { %v606_v47 = vpop.f32.mrf.mxu0 }
 0x29b   :  { %v608_v49 = vpop.f32.mrf.mxu0 }
 0x29f   :  { %2740 = vmatmul.msk.bf16.gmra.mxu2 %vm276_vm0, %v3886_v16 }
 0x2af   :  { %2741 = vmatmul.msk.bf16.gmra.mxu2 %vm276_vm0, %v3893_v22 }
 0x302   :  { %v4026_v36 = vpop.f32.mrf.mxu2 }
 0x30a   :  { %v584_v38 = vpop.f32.mrf.mxu2 }
 0x30b   :  { %v3363_v38 = vld [vmem:[#allocation5 + $0x78] sm:$0xff] }
 0x30c   :  { %789 = vmatpush.bf16.msrb.mxu2 %v3363_v38 }
 0x312   :  { %v620_v19 = vpop.f32.mrf.mxu2 }
 0x313   :  { %v621_v61 = vadd.f32 %v620_v19, %v596_v37  ;;  %v3368_v37 = vld [vmem:[#allocation5 + $0xa0] sm:$0xff] }
 0x31a   :  { %v622_v40 = vpop.f32.mrf.mxu2 }
 0x31b   :  { %v623_v58 = vadd.f32 %v622_v40, %v598_v39 }
 0x31d   :  { %v637_v1 = vpack.c.bf16 %v623_v58, %v621_v61  ;;  %v3381_v58 = vld [vmem:[%s4471_s5 + $0xa8] sm:$0xff]  ;;  %v3380_v61 = vld [vmem:[%s4471_s5 + $0xa0] sm:$0xff] }
 0x322   :  { %v625_v44 = vpop.f32.mrf.mxu2 }
 0x323   :  { %v626_v57 = vadd.f32 %v625_v44, %v601_v41 }
 0x32a   :  { %v627_v46 = vpop.f32.mrf.mxu2 }
 0x32b   :  { %v628_v55 = vadd.f32 %v627_v46, %v603_v27  ;;  %v3378_v27 = vld [vmem:[%s4471_s5 + $0x90] sm:$0xff] }
 0x32c   :  { %911 = vmatpush.bf16.msra.mxu0 %v3378_v27  ;;  %v3362_v46 = vld [vmem:[#allocation5 + $0x70] sm:$0xff] }
 0x32d   :  { %v638_v59 = vpack.c.bf16 %v628_v55, %v626_v57  ;;  %790 = vmatpush.bf16.msrb.mxu2 %v3362_v46  ;;  %v3374_v55 = vld [vmem:[%s4471_s5 + $0x70] sm:$0xff]  ;;  %v3373_v57 = vld [vmem:[%s4471_s5 + $0x68] sm:$0xff] }
 0x332   :  { %v630_v3 = vpop.f32.mrf.mxu2 }
 0x333   :  { %v631_v16 = vadd.f32 %v630_v3, %v606_v47  ;;  %v3377_v47 = vld [vmem:[%s4471_s5 + $0x88] sm:$0xff] }
 0x334   :  { %912 = vmatpush.bf16.msra.mxu0 %v3377_v47  ;;  %v3361_v3 = vld [vmem:[#allocation5 + $0x68] sm:$0xff] }
 0x335   :  { %791 = vmatpush.bf16.msrb.mxu2 %v3361_v3 }
 0x33a   :  { %v632_v51 = vpop.f32.mrf.mxu2 }
 0x33b   :  { %v633_v54 = vadd.f32 %v632_v51, %v608_v49  ;;  %v3376_v49 = vld [vmem:[%s4471_s5 + $0x80] sm:$0xff] }
 0x33c   :  { %913 = vmatpush.bf16.msra.mxu0 %v3376_v49  ;;  %v3360_v51 = vld [vmem:[#allocation5 + $0x60] sm:$0xff] }
 0x33d   :  { %v639_v22 = vpack.c.bf16 %v633_v54, %v631_v16  ;;  %792 = vmatpush.bf16.msrb.mxu2 %v3360_v51  ;;  %v3375_v16 = vld [vmem:[%s4471_s5 + $0x78] sm:$0xff] }
 0x33e   :  { %v3383_v54 = vld [vmem:[%s4471_s5 + $0xb8] sm:$0xff] }
 0x33f   :  { %648 = vmatpush.bf16.msrb.mxu3 %v639_v22  ;;  %928 = vmatpush.bf16.msrb.mxu1 %v3383_v54  ;;  %v3382_v22 = vld [vmem:[%s4471_s5 + $0xb0] sm:$0xff] }
 0x340   :  { %914 = vmatpush.bf16.msra.mxu0 %v3375_v16  ;;  %793 = vmatmul.bf16.vlgmr.msrb.gmra.mxu2 %v3846_v63 }
 0x343   :  { %649 = vmatpush.bf16.msrb.mxu3 %v638_v59  ;;  %929 = vmatpush.bf16.msrb.mxu1 %v3382_v22  ;;  %v3372_v59 = vld [vmem:[%s4471_s5 + $0x60] sm:$0xff] }
 0x344   :  { %915 = vmatpush.bf16.msra.mxu0 %v3374_v55 }
 0x347   :  { %650 = vmatpush.bf16.msrb.mxu3 %v637_v1  ;;  %930 = vmatpush.bf16.msrb.mxu1 %v3381_v58  ;;  %v3385_v1 = vld [vmem:[#allocation7 + $0x34] sm:$0xf0] }
 0x348   :  { %916 = vmatpush.bf16.msra.mxu0 %v3373_v57 }
 0x34a   :  { %2742 = vmatmul.msk.bf16.vlgmr.msrb.gmra.mxu3 %vm536_vm2, %v635_v6  ;;  %v2869_v6 = vor.u32 %v3385_v1, %v2868_v0 }
 0x34b   :  { %803 = vmatpush.bf16.msra.mxu3 %v3371_v17  ;;  %931 = vmatpush.bf16.msrb.mxu1 %v3380_v61  ;;  %v2876_v17 = vld [vmem:[#allocation7 + $0x40] sm:$0xf] }
 0x34c   :  { %917 = vmatpush.bf16.msra.mxu0 %v3372_v59 }
 0x34f   :  { %804 = vmatpush.bf16.msra.mxu3 %v3370_v23  ;;  %918 = vmatmul.bf16.vlgmr.msra.gmra.mxu0 %v3854_v2  ;;  %v2877_v23 = vor.u32 %v3387_v21, %v2876_v17 }
 0x353   :  { %805 = vmatpush.bf16.msra.mxu3 %v3369_v30  ;;  %v2885_v30 = vor.u32 %v3389_v26, %v2884_v33 }
 0x357   :  { %806 = vmatpush.bf16.msra.mxu3 %v3368_v37  ;;  %v2870_v37 = vld [vmem:[#allocation7 + $0x38] sm:$0xf0] }
 0x358   :  { %v4090_v38 = vor.u32 %v3384_v13, %v2870_v37 }
 0x35a   :  { %2792 = vmatmul.msk.bf16.vlgmr.msra.gmra.mxu3 %vm276_vm0, %v3762_v28 }
 0x35b   :  { %988 = vmatpush.bf16.msrb.mxu3 %v3752_v24 }
 0x35f   :  { %989 = vmatpush.bf16.msrb.mxu3 %v3777_v34 }
 0x363   :  { %990 = vmatpush.bf16.msrb.mxu3 %v3802_v42 }
 0x367   :  { %991 = vmatpush.bf16.msrb.mxu3 %v3823_v50 }
 0x36b   :  { %992 = vmatpush.bf16.msrb.mxu3 %v3844_v62 }
 0x36f   :  { %993 = vmatpush.bf16.msrb.mxu3 %v3859_v4 }
 0x373   :  { %994 = vmatpush.bf16.msrb.mxu3 %v3872_v7 }
 0x377   :  { %995 = vmatpush.bf16.msrb.mxu3 %v3881_v10 }
 0x37a   :  { %996 = vmatmul.bf16.vlgmr.msrb.gmra.mxu3 %v2869_v6 }
 0x38a   :  { %1001 = vmatmul.bf16.gmra.mxu3 %v2877_v23 }
 0x39a   :  { %1006 = vmatmul.bf16.gmra.mxu3 %v2885_v30 }
 0x3cc   :  { %v919_v51 = vpop.f32.mrf.mxu0 }
 0x3cd   :  { %v652_v8 = vpop.f32.mrf.mxu3 }
 0x3ce   :  { %v656_v11 = vsel %vm553_vm3, %v652_v8, -inf }
 0x3cf   :  { %657 = vmax.xlane.f32.xlu1 %v656_v11 }
 0x3d5   :  { %v654_v12 = vpop.f32.mrf.mxu3 }
 0x3dd   :  { %v808_v47 = vpop.f32.mrf.mxu3 }
 0x3e5   :  { %v4109_v49 = vpop.f32.mrf.mxu3 }
 0x3fd   :  { %v997_v57 = vpop.f32.mrf.mxu3 }
 0x405   :  { %v999_v59 = vpop.f32.mrf.mxu3 }
 0x40d   :  { %v1002_v1 = vpop.f32.mrf.mxu3 }
 0x442   :  { %v658_v39 = vpop.xlane.xlu1 %657 }
 0x443   :  { %v659_v19 = vsub.f32 %v652_v8, %v658_v39  ;;  %v3386_v39 = vld [vmem:[#allocation7 + $0x44] sm:$0xf] }
 0x445   :  { %v660_v40 = vmul.f32 1.442695, %v659_v19  ;;  %v2878_v19 = vld [vmem:[#allocation7 + $0x48] sm:$0xf0] }
 0x447   :  { %3483 = vpow2.f32 %v660_v40  ;;  %v4098_v40 = vor.u32 %v3386_v39, %v2878_v19  ;;  %v794_v19 = vpop.f32.mrf.mxu2 }
 0x44d   :  { %v3484_v41 = vpop.eup %3483 }
 0x44e   :  { %v662_v44 = vsel %vm553_vm3, %v3484_v41, 0.0 }
 0x44f   :  { %663 = vadd.xlane.f32.xlu1 %v662_v44  ;;  %v2886_v44 = vld [vmem:[#allocation7 + $0x58] sm:$0xf0] }
 0x4c2   :  { %v664_v8 = vpop.xlane.xlu1 %663 }
 0x4c3   :  { %3485 = vrcp.f32 %v664_v8  ;;  %v1004_v8 = vpop.f32.mrf.mxu3 }
 0x4c9   :  { %v3486_v11 = vpop.eup %3485 }
 0x4ca   :  { %v666_v12 = vmul.f32 %v3486_v11, %v3484_v41  ;;  %v3388_v41 = vld [vmem:[#allocation7 + $0x54] sm:$0xf] }
 0x4cb   :  { %v4103_v27 = vor.u32 %v3388_v41, %v2886_v44  ;;  %v809_v44 = vadd.f32 %v808_v47, %v794_v19  ;;  %v3394_v47 = vld [vmem:[#allocation8 + $0x54] sm:$0xf] }
 0x4cc   :  { %v667_v15 = vpack.c.bf16 %v666_v12, %v666_v12  ;;  %v1007_v12 = vpop.f32.mrf.mxu3 }
 0x4ce   :  { %2743 = vmatmul.msk.bf16.vlgmr.msra.gmra.mxu1 %vm553_vm3, %v667_v15 }
 0x4cf   :  { %1016 = vmatpush.bf16.msra.mxu1 %v3754_v25 }
 0x4d3   :  { %1017 = vmatpush.bf16.msra.mxu1 %v3779_v35 }
 0x4d4   :  { %v1009_v17 = vpop.f32.mrf.mxu3 }
 0x4d7   :  { %1018 = vmatpush.bf16.msra.mxu1 %v3804_v43 }
 0x4db   :  { %1019 = vmatpush.bf16.msra.mxu1 %v3825_v52 }
 0x4de   :  { %2865 = vmatmul.msk.bf16.vlgmr.msrb.gmra.mxu1 %vm276_vm0, %v3770_v31 }
 0x4df   :  { %1207 = vmatpush.bf16.msrb.mxu1 %v3916_v29 }
 0x4e3   :  { %1208 = vmatpush.bf16.msrb.mxu1 %v3922_v32 }
 0x4e7   :  { %1209 = vmatpush.bf16.msrb.mxu1 %v3932_v45 }
 0x4eb   :  { %1210 = vmatpush.bf16.msrb.mxu1 %v3941_v48 }
 0x4ee   :  { %2890 = vmatmul.msk.bf16.vlgmr.msra.gmra.mxu1 %vm276_vm0, %v4090_v38 }
 0x4ef   :  { %1211 = vmatpush.bf16.msrb.mxu1 %v3950_v53 }
 0x4f3   :  { %1212 = vmatpush.bf16.msrb.mxu1 %v3971_v60 }
 0x4f7   :  { %1213 = vmatpush.bf16.msrb.mxu1 %v3991_v9 }
 0x4fb   :  { %1214 = vmatpush.bf16.msrb.mxu1 %v4009_v18 }
 0x4fe   :  { %2891 = vmatmul.msk.bf16.gmra.mxu1 %vm276_vm0, %v4098_v40 }
 0x50e   :  { %2892 = vmatmul.msk.bf16.gmra.mxu1 %vm276_vm0, %v4103_v27 }
 0x51e   :  { %1215 = vmatmul.bf16.vlgmr.msrb.gmra.mxu1 %v2869_v6 }
 0x52e   :  { %1220 = vmatmul.bf16.gmra.mxu1 %v2877_v23 }
 0x53e   :  { %1225 = vmatmul.bf16.gmra.mxu1 %v2885_v30 }
 0x54b   :  { %v4107_v46 = vpop.f32.mrf.mxu1 }
 0x553   :  { %v685_v3 = vpop.f32.mrf.mxu1 }
 0x55b   :  { %v933_v16 = vpop.f32.mrf.mxu1 }
 0x55c   :  { %v934_v54 = vadd.f32 %v933_v16, %v919_v51  ;;  %v1036_v51 = vpack.c.bf16 %v809_v44, %v809_v44  ;;  %v4115_v16 = vpop.f32.mrf.mxu2  ;;  %v2941_v44 = vld [vmem:[#allocation8 + $0x28] sm:$0xf0] }
 0x55e   :  { %v1037_v55 = vpack.c.bf16 %v934_v54, %v934_v54 }
 0x560   :  { %v1073_v22 = vsel %vm569_vm1, %v1037_v55, 0 }
 0x561   :  { %1082 = vmatpush.bf16.msrb.mxu0 %v1073_v22 }
 0x563   :  { %v4112_v58 = vpop.f32.mrf.mxu1 }
 0x56b   :  { %v1021_v61 = vpop.f32.mrf.mxu1 }
 0x56c   :  { %v1022_v41 = vadd.f32 %v1021_v61, %v997_v57  ;;  %v2915_v61 = vld [vmem:[#allocation8 + $0x58] sm:$0xf0] }
 0x573   :  { %v1023_v0 = vpop.f32.mrf.mxu1 }
 0x574   :  { %v1024_v37 = vadd.f32 %v1023_v0, %v999_v59 }
 0x576   :  { %v1038_v3 = vpack.c.bf16 %v1024_v37, %v1022_v41  ;;  %v3358_v41 = vld [vmem:[#allocation8 + $0x24] sm:$0xf] }
 0x57b   :  { %v1026_v6 = vpop.f32.mrf.mxu1 }
 0x57c   :  { %v1027_v13 = vadd.f32 %v1026_v6, %v1002_v1 }
 0x583   :  { %v1028_v11 = vpop.f32.mrf.mxu1 }
 0x584   :  { %v1029_v26 = vadd.f32 %v1028_v11, %v1004_v8  ;;  %v3392_v8 = vld [vmem:[#allocation8 + $0x44] sm:$0xf]  ;;  %v4119_v11 = vor.u32 %v3394_v47, %v2915_v61 }
 0x585   :  { %v3354_v61 = vld [vmem:[#allocation8 + $0x4] sm:$0xf] }
 0x586   :  { %v1039_v39 = vpack.c.bf16 %v1029_v26, %v1027_v13  ;;  %1140 = vmatpush.bf16.msra.mxu0 %v4119_v11  ;;  %v3393_v26 = vld [vmem:[#allocation8 + $0x44] sm:$0xf0]  ;;  %v2899_v13 = vld [vmem:[#allocation8 + $0x38] sm:$0xf0] }
 0x58b   :  { %v1031_v15 = vpop.f32.mrf.mxu1 }
 0x58c   :  { %v1032_v23 = vadd.f32 %v1031_v15, %v1007_v12  ;;  %v2907_v12 = vld [vmem:[#allocation8 + $0x48] sm:$0xf0]  ;;  %v2913_v15 = vld [vmem:[#allocation8 + $0x50] sm:$0xf] }
 0x593   :  { %v1033_v21 = vpop.f32.mrf.mxu1 }
 0x594   :  { %v1034_v33 = vadd.f32 %v1033_v21, %v1009_v17  ;;  %v3395_v17 = vld [vmem:[#allocation8 + $0x54] sm:$0xf0] }
 0x595   :  { %v4121_v21 = vor.u32 %v3395_v17, %v2913_v15  ;;  %v3359_v15 = vld [vmem:[#allocation8 + $0x24] sm:$0xf0] }
 0x596   :  { %v1040_v30 = vpack.c.bf16 %v1034_v33, %v1032_v23  ;;  %v2910_v23 = vor.u32 %v3392_v8, %v2907_v12  ;;  %v2905_v33 = vld [vmem:[#allocation8 + $0x40] sm:$0xf]  ;;  %v2925_v8 = vld [vmem:[#allocation8 + $0x8] sm:$0xf0] }
 0x597   :  { %v4125_v37 = vor.u32 %v3393_v26, %v2905_v33  ;;  %v2939_v12 = vld [vmem:[#allocation8 + $0x20] sm:$0xf]  ;;  %v2931_v33 = vld [vmem:[#allocation8 + $0x10] sm:$0xf]  ;;  %v3357_v26 = vld [vmem:[#allocation8 + $0x14] sm:$0xf0] }
 0x598   :  { %1049 = vmatpush.bf16.msra.mxu2 %v1040_v30  ;;  %v3390_v30 = vld [vmem:[#allocation8 + $0x34] sm:$0xf]  ;;  %1141 = vmatpush.bf16.msra.mxu0 %v2910_v23  ;;  %v4141_v17 = vor.u32 %v3359_v15, %v2939_v12 }
 0x59c   :  { %1050 = vmatpush.bf16.msra.mxu2 %v1039_v39  ;;  %v2902_v39 = vor.u32 %v3390_v30, %v2899_v13  ;;  %v4144_v30 = vor.u32 %v3357_v26, %v2931_v33  ;;  %v2923_v13 = vld [vmem:[#allocation8] sm:$0xf] }
 0x59e   :  { %1142 = vmatpush.bf16.msra.mxu0 %v2902_v39 }
 0x5a0   :  { %1051 = vmatpush.bf16.msra.mxu2 %v1038_v3 }
 0x5a3   :  { %2893 = vmatmul.msk.bf16.vlgmr.msra.gmra.mxu2 %vm536_vm2, %v1036_v51 }
 0x5a4   :  { %1127 = vmatpush.bf16.msrb.mxu2 %v4121_v21 }
 0x5a8   :  { %1128 = vmatpush.bf16.msrb.mxu2 %v4125_v37 }
 0x626   :  { %v1053_v54 = vpop.f32.mrf.mxu2 }
 0x627   :  { %v1057_v55 = vsel %vm553_vm3, %v1053_v54, -inf }
 0x628   :  { %1058 = vmax.xlane.f32.xlu2 %v1057_v55 }
 0x62e   :  { %v1055_v22 = vpop.f32.mrf.mxu2 }
 0x62f   :  { %v3356_v22 = vld [vmem:[#allocation8 + $0x14] sm:$0xf] }
 0x69b   :  { %v1059_v1 = vpop.xlane.xlu2 %1058 }
 0x69c   :  { %v1060_v6 = vsub.f32 %v1053_v54, %v1059_v1  ;;  %v4128_v54 = vor.u32 %v3358_v41, %v2941_v44  ;;  %v2933_v1 = vld [vmem:[#allocation8 + $0x18] sm:$0xf0]  ;;  %v921_v44 = vpop.f32.mrf.mxu0 }
 0x69e   :  { %v1061_v59 = vmul.f32 1.442695, %v1060_v6  ;;  %v4132_v6 = vor.u32 %v3356_v22, %v2933_v1 }
 0x6a0   :  { %3487 = vpow2.f32 %v1061_v59  ;;  %v2897_v59 = vld [vmem:[#allocation8 + $0x30] sm:$0xf] }
 0x6a6   :  { %v3488_v0 = vpop.eup %3487 }
 0x6a7   :  { %v1063_v57 = vsel %vm553_vm3, %v3488_v0, 0.0 }
 0x6a8   :  { %1064 = vadd.xlane.f32.xlu2 %v1063_v57  ;;  %v3391_v57 = vld [vmem:[#allocation8 + $0x34] sm:$0xf0] }
 0x6a9   :  { %v4135_v47 = vor.u32 %v3391_v57, %v2897_v59 }
 0x6ab   :  { %1129 = vmatpush.bf16.msrb.mxu2 %v4135_v47 }
 0x6af   :  { %1186 = vmatpush.bf16.msra.mxu2 %v4141_v17 }
 0x6b3   :  { %1187 = vmatpush.bf16.msra.mxu2 %v4144_v30 }
 0x71b   :  { %v1065_v19 = vpop.xlane.xlu2 %1064 }
 0x71c   :  { %3489 = vrcp.f32 %v1065_v19  ;;  %v3355_v19 = vld [vmem:[#allocation8 + $0x4] sm:$0xf0] }
 0x71d   :  { %v4147_v41 = vor.u32 %v3355_v19, %v2923_v13 }
 0x71f   :  { %1188 = vmatpush.bf16.msra.mxu2 %v4147_v41 }
 0x722   :  { %v3490_v3 = vpop.eup %3489 }
 0x723   :  { %v1067_v51 = vmul.f32 %v3490_v3, %v3488_v0  ;;  %v4138_v0 = vor.u32 %v3354_v61, %v2925_v8  ;;  %v936_v3 = vadd.f32 %v4112_v58, %v921_v44  ;;  %v586_v58 = vpack.c.bf16 %v4026_v36, %v4026_v36 }
 0x725   :  { %v1068_v55 = vpack.c.bf16 %v1067_v51, %v1067_v51  ;;  %v1256_v51 = vpack.c.bf16 %v936_v3, %v936_v3 }
 0x727   :  { %2894 = vmatmul.msk.bf16.vlgmr.msrb.gmra.mxu0 %vm553_vm3, %v1068_v55  ;;  %v1292_v1 = vsel %vm569_vm1, %v1256_v51, 0 }
 0x728   :  { %1199 = vmatpush.bf16.msrb.mxu0 %v4128_v54 }
 0x72c   :  { %1200 = vmatpush.bf16.msrb.mxu0 %v4132_v6 }
 0x730   :  { %1201 = vmatpush.bf16.msrb.mxu0 %v4138_v0 }
 0x7a4   :  { %v1084_v55 = vpop.f32.mrf.mxu0 }
 0x7a5   :  { %v1088_v22 = vpack.c.bf16 %v1084_v55, %v1084_v55 }
 0x7a7   :  { %2919 = vmatmul.msk.bf16.vlgmr.msrb.gmra.mxu2 %vm536_vm2, %v1088_v22  ;;  %2920 = vmatmul.msk.bf16.vlgmr.msra.gmra.mxu0 %vm536_vm2, %v1088_v22 }
 0x7a8   :  { %1301 = vmatpush.bf16.msra.mxu0 %v1292_v1  ;;  %1235 = vmatpush.bf16.msrb.mxu2 %v3959_v56 }
 0x7ac   :  { %v1086_v59 = vpop.f32.mrf.mxu0  ;;  %1236 = vmatpush.bf16.msrb.mxu2 %v3982_v5 }
 0x7b0   :  { %1237 = vmatpush.bf16.msrb.mxu2 %v4000_v14 }
 0x7b4   :  { %1238 = vmatpush.bf16.msrb.mxu2 %v4012_v20 }
 0x7b7   :  { %2945 = vmatmul.msk.bf16.vlgmr.msra.gmra.mxu2 %vm536_vm2, %v586_v58  ;;  %2946 = vmatmul.msk.bf16.vlgmr.msrb.gmra.mxu0 %vm536_vm2, %v586_v58 }
 0x7b8   :  { %1329 = vmatpush.bf16.msrb.mxu0 %v4119_v11 }
 0x7bc   :  { %1330 = vmatpush.bf16.msrb.mxu0 %v2910_v23 }
 0x7c0   :  { %1331 = vmatpush.bf16.msrb.mxu0 %v2902_v39  ;;  %v1216_v39 = vpop.f32.mrf.mxu1 }
 0x7c7   :  { %2947 = vmatmul.msk.bf16.vlgmr.msrb.gmra.mxu2 %vm276_vm0, %v4090_v38 }
 0x7c8   :  { %v1218_v38 = vpop.f32.mrf.mxu1 }
 0x7d7   :  { %2948 = vmatmul.msk.bf16.gmra.mxu2 %vm276_vm0, %v4098_v40  ;;  %v1221_v40 = vpop.f32.mrf.mxu1 }
 0x7df   :  { %v1223_v3 = vpop.f32.mrf.mxu1 }
 0x7e7   :  { %2949 = vmatmul.msk.bf16.gmra.mxu2 %vm276_vm0, %v4103_v27  ;;  %v1226_v51 = vpop.f32.mrf.mxu1 }
 0x7ef   :  { %v1228_v22 = vpop.f32.mrf.mxu1 }
 0x824   :  { %v1144_v57 = vpop.f32.mrf.mxu0 }
 0x82a   :  { %v1131_v61 = vpop.f32.mrf.mxu2 }
 0x82c   :  { %v1146_v36 = vpop.f32.mrf.mxu0 }
 0x832   :  { %v1133_v8 = vpop.f32.mrf.mxu2 }
 0x834   :  { %v1203_v12 = vpop.f32.mrf.mxu0 }
 0x835   :  { %v4169_v15 = vadd.f32 %v1203_v12, %v1144_v57 }
 0x837   :  { %4475 = vst [vmem:[#allocation15_spill] sm:$0xff] %v4169_v15 }
 0x83a   :  { %v1190_v33 = vpop.f32.mrf.mxu2 }
 0x83b   :  { %v4171_v11 = vadd.f32 %v1190_v33, %v1131_v61 }
 0x83c   :  { %v1205_v23 = vpop.f32.mrf.mxu0 }
 0x83d   :  { %v811_v23 = vadd.f32 %v4109_v49, %v4115_v16 }
 0x83f   :  { %v1255_v15 = vpack.c.bf16 %v811_v23, %v811_v23  ;;  %v3088_v23 = vld [vmem:[#allocation7 + $0x70] sm:$0xf] }
 0x842   :  { %v1192_v26 = vpop.f32.mrf.mxu2 }
 0x84a   :  { %v1240_v13 = vpop.f32.mrf.mxu2 }
 0x84b   :  { %v1241_v33 = vadd.f32 %v1240_v13, %v1216_v39  ;;  %v3407_v13 = vld [vmem:[#allocation5 + $0x118] sm:$0xff] }
 0x84c   :  { %1481 = vmatpush.bf16.msra.mxu2 %v3407_v13  ;;  %v3425_v13 = vld [vmem:[#allocation7 + $0x84] sm:$0xf0] }
 0x852   :  { %v1242_v19 = vpop.f32.mrf.mxu2 }
 0x853   :  { %v1243_v8 = vadd.f32 %v1242_v19, %v1218_v38  ;;  %v3403_v38 = vld [vmem:[#allocation5 + $0xf8] sm:$0xff]  ;;  %v3398_v19 = vld [vmem:[#allocation5 + $0xd0] sm:$0xff] }
 0x854   :  { %1463 = vmatpush.bf16.msra.mxu1 %v3403_v38 }
 0x855   :  { %v1257_v26 = vpack.c.bf16 %v1243_v8, %v1241_v33  ;;  %v3422_v8 = vld [vmem:[#allocation7 + $0x74] sm:$0xf] }
 0x85a   :  { %v1245_v44 = vpop.f32.mrf.mxu2 }
 0x85b   :  { %v1246_v61 = vadd.f32 %v1245_v44, %v1221_v40 }
 0x862   :  { %v1247_v27 = vpop.f32.mrf.mxu2 }
 0x863   :  { %v1248_v57 = vadd.f32 %v1247_v27, %v1223_v3  ;;  %v3397_v27 = vld [vmem:[#allocation5 + $0xc8] sm:$0xff] }
 0x865   :  { %v1258_v12 = vpack.c.bf16 %v1248_v57, %v1246_v61  ;;  %v3080_v57 = vld [vmem:[#allocation7 + $0x60] sm:$0xf] }
 0x86a   :  { %v1250_v55 = vpop.f32.mrf.mxu2 }
 0x86b   :  { %v1251_v59 = vadd.f32 %v1250_v55, %v1226_v51  ;;  %v3396_v51 = vld [vmem:[#allocation5 + $0xc0] sm:$0xff] }
 0x86c   :  { %v3420_v55 = vld [vmem:[#allocation7 + $0x64] sm:$0xf] }
 0x872   :  { %v1252_v1 = vpop.f32.mrf.mxu2 }
 0x873   :  { %v1253_v58 = vadd.f32 %v1252_v1, %v1228_v22  ;;  %v3082_v22 = vld [vmem:[#allocation7 + $0x68] sm:$0xf0] }
 0x875   :  { %v1259_v36 = vpack.c.bf16 %v1253_v58, %v1251_v59  ;;  %v4192_v58 = vor.u32 %v3420_v55, %v3082_v22 }
 0x877   :  { %1268 = vmatpush.bf16.msra.mxu3 %v1259_v36  ;;  %v3421_v36 = vld [vmem:[#allocation7 + $0x64] sm:$0xf0] }
 0x878   :  { %v3081_v61 = vor.u32 %v3421_v36, %v3080_v57 }
 0x87b   :  { %1269 = vmatpush.bf16.msra.mxu3 %v1258_v12  ;;  %v3090_v12 = vld [vmem:[#allocation7 + $0x78] sm:$0xf0] }
 0x87c   :  { %v4211_v33 = vor.u32 %v3422_v8, %v3090_v12 }
 0x87f   :  { %1270 = vmatpush.bf16.msra.mxu3 %v1257_v26  ;;  %v3423_v26 = vld [vmem:[#allocation7 + $0x74] sm:$0xf0] }
 0x882   :  { %2950 = vmatmul.msk.bf16.vlgmr.msra.gmra.mxu3 %vm536_vm2, %v1255_v15  ;;  %v3406_v15 = vld [vmem:[#allocation5 + $0x110] sm:$0xff] }
 0x883   :  { %1316 = vmatpush.bf16.msrb.mxu3 %v4121_v21  ;;  %v3402_v21 = vld [vmem:[#allocation5 + $0xf0] sm:$0xff]  ;;  %1482 = vmatpush.bf16.msra.mxu2 %v3406_v15 }
 0x884   :  { %1464 = vmatpush.bf16.msra.mxu1 %v3402_v21  ;;  %v3096_v21 = vld [vmem:[#allocation7 + $0x80] sm:$0xf] }
 0x885   :  { %v3097_v15 = vor.u32 %v3425_v13, %v3096_v21 }
 0x887   :  { %1317 = vmatpush.bf16.msrb.mxu3 %v4125_v37  ;;  %v3401_v37 = vld [vmem:[#allocation5 + $0xe8] sm:$0xff] }
 0x888   :  { %1465 = vmatpush.bf16.msra.mxu1 %v3401_v37 }
 0x88b   :  { %1318 = vmatpush.bf16.msrb.mxu3 %v4135_v47  ;;  %v3405_v47 = vld [vmem:[#allocation5 + $0x108] sm:$0xff] }
 0x88c   :  { %1483 = vmatpush.bf16.msra.mxu2 %v3405_v47 }
 0x88f   :  { %1345 = vmatpush.bf16.msra.mxu3 %v4141_v17  ;;  %v3400_v17 = vld [vmem:[#allocation5 + $0xe0] sm:$0xff] }
 0x890   :  { %1466 = vmatpush.bf16.msra.mxu1 %v3400_v17 }
 0x893   :  { %1346 = vmatpush.bf16.msra.mxu3 %v4144_v30  ;;  %v3404_v30 = vld [vmem:[#allocation5 + $0x100] sm:$0xff] }
 0x894   :  { %1484 = vmatpush.bf16.msra.mxu2 %v3404_v30 }
 0x897   :  { %1347 = vmatpush.bf16.msra.mxu3 %v4147_v41  ;;  %v3399_v41 = vld [vmem:[#allocation5 + $0xd8] sm:$0xff]  ;;  %3004 = vmatmul.msk.bf16.vlgmr.msra.gmra.mxu2 %vm276_vm0, %v3762_v28 }
 0x898   :  { %1694 = vmatpush.bf16.msrb.mxu2 %v3754_v25  ;;  %1467 = vmatpush.bf16.msra.mxu1 %v3399_v41 }
 0x89c   :  { %1695 = vmatpush.bf16.msrb.mxu2 %v3779_v35  ;;  %1468 = vmatpush.bf16.msra.mxu1 %v3398_v19 }
 0x8a0   :  { %1696 = vmatpush.bf16.msrb.mxu2 %v3804_v43  ;;  %1469 = vmatpush.bf16.msra.mxu1 %v3397_v27 }
 0x8a4   :  { %1697 = vmatpush.bf16.msrb.mxu2 %v3825_v52  ;;  %1470 = vmatpush.bf16.msra.mxu1 %v3396_v51 }
 0x8a7   :  { %1471 = vmatmul.bf16.vlgmr.msra.gmra.mxu1 %v3846_v63  ;;  %3102 = vmatmul.msk.bf16.vlgmr.msrb.gmra.mxu2 %vm276_vm0, %v4192_v58 }
 0x8a8   :  { %1828 = vmatpush.bf16.msra.mxu2 %v3916_v29  ;;  %1666 = vmatpush.bf16.msrb.mxu1 %v3752_v24 }
 0x8ac   :  { %1829 = vmatpush.bf16.msra.mxu2 %v3922_v32  ;;  %1667 = vmatpush.bf16.msrb.mxu1 %v3777_v34 }
 0x8b0   :  { %1830 = vmatpush.bf16.msra.mxu2 %v3932_v45  ;;  %1668 = vmatpush.bf16.msrb.mxu1 %v3802_v42 }
 0x8b4   :  { %1831 = vmatpush.bf16.msra.mxu2 %v3941_v48  ;;  %1669 = vmatpush.bf16.msrb.mxu1 %v3823_v50 }
 0x8b7   :  { %3103 = vmatmul.msk.bf16.gmra.mxu2 %vm276_vm0, %v4211_v33 }
 0x8b8   :  { %1832 = vmatpush.bf16.msra.mxu2 %v3950_v53  ;;  %1670 = vmatpush.bf16.msrb.mxu1 %v3844_v62 }
 0x8bc   :  { %1833 = vmatpush.bf16.msra.mxu2 %v3971_v60  ;;  %1671 = vmatpush.bf16.msrb.mxu1 %v3859_v4 }
 0x8c0   :  { %1834 = vmatpush.bf16.msra.mxu2 %v3991_v9  ;;  %1672 = vmatpush.bf16.msrb.mxu1 %v3872_v7 }
 0x8c4   :  { %1835 = vmatpush.bf16.msra.mxu2 %v4009_v18  ;;  %1673 = vmatpush.bf16.msrb.mxu1 %v3881_v10 }
 0x8c7   :  { %1674 = vmatmul.bf16.vlgmr.msrb.gmra.mxu1 %v3081_v61 }
 0x905   :  { %v1272_v39 = vpop.f32.mrf.mxu3 }
 0x906   :  { %v1276_v49 = vsel %vm553_vm3, %v1272_v39, -inf }
 0x907   :  { %1277 = vmax.xlane.f32.xlu0 %v1276_v49  ;;  %v3424_v49 = vld [vmem:[#allocation7 + $0x84] sm:$0xf] }
 0x90d   :  { %v1274_v16 = vpop.f32.mrf.mxu3 }
 0x90e   :  { %v3098_v16 = vld [vmem:[#allocation7 + $0x88] sm:$0xf0] }
 0x90f   :  { %v4215_v38 = vor.u32 %v3424_v49, %v3098_v16  ;;  %v3417_v49 = vld [vmem:[%s4471_s5 + $0x108] sm:$0xff] }
 0x910   :  { %v3413_v16 = vld [vmem:[%s4471_s5 + $0xe8] sm:$0xff] }
 0x911   :  { %3104 = vmatmul.msk.bf16.gmra.mxu2 %vm276_vm0, %v4215_v38 }
 0x91a   :  { %v1486_v19 = vpop.f32.mrf.mxu2 }
 0x921   :  { %1836 = vmatmul.bf16.vlgmr.msra.gmra.mxu2 %v3081_v61 }
 0x924   :  { %v1472_v41 = vpop.f32.mrf.mxu1 }
 0x97a   :  { %v1278_v40 = vpop.xlane.xlu0 %1277 }
 0x97b   :  { %v1279_v44 = vsub.f32 %v1272_v39, %v1278_v40  ;;  %v3089_v39 = vor.u32 %v3423_v26, %v3088_v23  ;;  %v4220_v40 = vadd.f32 %v1486_v19, %v1472_v41  ;;  %v3418_v23 = vld [vmem:[%s4471_s5 + $0x110] sm:$0xff]  ;;  %v3411_v41 = vld [vmem:[%s4471_s5 + $0xd8] sm:$0xff]  ;;  %v687_v19 = vpack.c.bf16 %v4107_v46, %v4107_v46  ;;  %v3409_v46 = vld [vmem:[%s4471_s5 + $0xc8] sm:$0xff] }
 0x97c   :  { %v3414_v26 = vld [vmem:[%s4471_s5 + $0xf0] sm:$0xff] }
 0x97d   :  { %v1280_v3 = vmul.f32 1.442695, %v1279_v44  ;;  %1679 = vmatmul.bf16.gmra.mxu1 %v3089_v39  ;;  %1841 = vmatmul.bf16.gmra.mxu2 %v3089_v39  ;;  %v4225_v44 = vpop.f32.mrf.mxu1 }
 0x97f   :  { %3491 = vpow2.f32 %v1280_v3  ;;  %v4227_v3 = vpop.f32.mrf.mxu2 }
 0x985   :  { %v3492_v1 = vpop.eup %3491  ;;  %v1675_v27 = vpop.f32.mrf.mxu1 }
 0x986   :  { %v1282_v59 = vsel %vm553_vm3, %v3492_v1, 0.0 }
 0x987   :  { %1283 = vadd.xlane.f32.xlu1 %v1282_v59  ;;  %v1699_v51 = vpop.f32.mrf.mxu2 }
 0x98d   :  { %1684 = vmatmul.bf16.gmra.mxu1 %v3097_v15  ;;  %1846 = vmatmul.bf16.gmra.mxu2 %v3097_v15  ;;  %v1677_v55 = vpop.f32.mrf.mxu1 }
 0x98f   :  { %v1701_v22 = vpop.f32.mrf.mxu2 }
 0x997   :  { %v1704_v59 = vpop.f32.mrf.mxu2 }
 0x99f   :  { %v1706_v36 = vpop.f32.mrf.mxu2 }
 0x9fa   :  { %v1284_v37 = vpop.xlane.xlu1 %1283 }
 0x9fb   :  { %3493 = vrcp.f32 %v1284_v37 }
 0xa01   :  { %v3494_v47 = vpop.eup %3493 }
 0xa02   :  { %v1286_v17 = vmul.f32 %v3494_v47, %v3492_v1  ;;  %v1680_v1 = vpop.f32.mrf.mxu1  ;;  %v3416_v47 = vld [vmem:[%s4471_s5 + $0x100] sm:$0xff] }
 0xa04   :  { %v1287_v30 = vpack.c.bf16 %v1286_v17, %v1286_v17  ;;  %v3412_v17 = vld [vmem:[%s4471_s5 + $0xe0] sm:$0xff] }
 0xa06   :  { %2951 = vmatmul.msk.bf16.vlgmr.msra.gmra.mxu0 %vm553_vm3, %v1287_v30 }
 0xa07   :  { %1358 = vmatpush.bf16.msra.mxu0 %v4128_v54  ;;  %v1709_v54 = vpop.f32.mrf.mxu2 }
 0xa0a   :  { %v1682_v57 = vpop.f32.mrf.mxu1 }
 0xa0b   :  { %1359 = vmatpush.bf16.msra.mxu0 %v4132_v6  ;;  %v3419_v6 = vld [vmem:[%s4471_s5 + $0x118] sm:$0xff] }
 0xa0f   :  { %1360 = vmatpush.bf16.msra.mxu0 %v4138_v0  ;;  %v3415_v0 = vld [vmem:[%s4471_s5 + $0xf8] sm:$0xff]  ;;  %v1711_v13 = vpop.f32.mrf.mxu2 }
 0xa12   :  { %v1685_v61 = vpop.f32.mrf.mxu1 }
 0xa13   :  { %v1710_v15 = vadd.f32 %v1709_v54, %v1685_v61  ;;  %v1705_v61 = vadd.f32 %v1704_v59, %v1680_v1  ;;  %v1707_v54 = vadd.f32 %v1706_v36, %v1682_v57  ;;  %v3408_v59 = vld [vmem:[%s4471_s5 + $0xc0] sm:$0xff] }
 0xa1a   :  { %v1687_v21 = vpop.f32.mrf.mxu1 }
 0xa1b   :  { %v1712_v37 = vadd.f32 %v1711_v13, %v1687_v21 }
 0xa1d   :  { %v1718_v30 = vpack.c.bf16 %v1712_v37, %v1710_v15 }
 0xa83   :  { %v1303_v8 = vpop.f32.mrf.mxu0 }
 0xa84   :  { %v1307_v12 = vpack.c.bf16 %v1303_v8, %v1303_v8  ;;  %v3410_v8 = vld [vmem:[%s4471_s5 + $0xd0] sm:$0xff] }
 0xa86   :  { %2952 = vmatmul.msk.bf16.vlgmr.msrb.gmra.mxu3 %vm536_vm2, %v1307_v12  ;;  %2953 = vmatmul.msk.bf16.vlgmr.msrb.gmra.mxu0 %vm536_vm2, %v1307_v12  ;;  %v1717_v12 = vpack.c.bf16 %v1707_v54, %v1705_v61 }
 0xa87   :  { %1606 = vmatpush.bf16.msrb.mxu0 %v3419_v6  ;;  %1588 = vmatpush.bf16.msrb.mxu3 %v3415_v0  ;;  %v1700_v6 = vadd.f32 %v1699_v51, %v1675_v27  ;;  %v1702_v0 = vadd.f32 %v1701_v22, %v1677_v55  ;;  %v1714_v27 = vpack.c.bf16 %v4220_v40, %v4220_v40 }
 0xa89   :  { %v1716_v1 = vpack.c.bf16 %v1702_v0, %v1700_v6 }
 0xa8b   :  { %v1305_v39 = vpop.f32.mrf.mxu0  ;;  %1607 = vmatpush.bf16.msrb.mxu0 %v3418_v23  ;;  %1589 = vmatpush.bf16.msrb.mxu3 %v3414_v26 }
 0xa8f   :  { %1608 = vmatpush.bf16.msrb.mxu0 %v3417_v49  ;;  %1590 = vmatpush.bf16.msrb.mxu3 %v3413_v16 }
 0xa93   :  { %1609 = vmatpush.bf16.msrb.mxu0 %v3416_v47  ;;  %1591 = vmatpush.bf16.msrb.mxu3 %v3412_v17 }
 0xa96   :  { %2954 = vmatmul.msk.bf16.vlgmr.msra.gmra.mxu3 %vm536_vm2, %v687_v19  ;;  %2955 = vmatmul.msk.bf16.vlgmr.msra.gmra.mxu0 %vm536_vm2, %v687_v19 }
 0xa97   :  { %1727 = vmatpush.bf16.msra.mxu0 %v1718_v30  ;;  %1592 = vmatpush.bf16.msrb.mxu3 %v3411_v41 }
 0xa9b   :  { %1728 = vmatpush.bf16.msra.mxu0 %v1717_v12  ;;  %1593 = vmatpush.bf16.msrb.mxu3 %v3410_v8 }
 0xa9f   :  { %1729 = vmatpush.bf16.msra.mxu0 %v1716_v1  ;;  %1594 = vmatpush.bf16.msrb.mxu3 %v3409_v46 }
 0xaa3   :  { %1595 = vmatpush.bf16.msrb.mxu3 %v3408_v59  ;;  %v3125_v59 = vld [vmem:[#allocation8 + $0x80] sm:$0xf] }
 0xaa6   :  { %3077 = vmatmul.msk.bf16.vlgmr.msrb.gmra.mxu0 %vm276_vm0, %v3770_v31  ;;  %1596 = vmatmul.bf16.vlgmr.msrb.gmra.mxu3 %v3854_v2 }
 0xab6   :  { %3105 = vmatmul.msk.bf16.vlgmr.msra.gmra.mxu0 %vm536_vm2, %v1714_v27  ;;  %v3431_v27 = vld [vmem:[#allocation8 + $0x84] sm:$0xf0] }
 0xb03   :  { %v1333_v51 = vpop.f32.mrf.mxu0 }
 0xb09   :  { %v1320_v55 = vpop.f32.mrf.mxu3 }
 0xb0b   :  { %v1335_v22 = vpop.f32.mrf.mxu0 }
 0xb0c   :  { %v3127_v22 = vld [vmem:[#allocation8 + $0x88] sm:$0xf0] }
 0xb11   :  { %v1322_v57 = vpop.f32.mrf.mxu3 }
 0xb12   :  { %v3117_v57 = vld [vmem:[#allocation8 + $0x70] sm:$0xf] }
 0xb13   :  { %v1362_v36 = vpop.f32.mrf.mxu0 }
 0xb14   :  { %v4277_v23 = vadd.f32 %v1362_v36, %v1333_v51  ;;  %v3430_v51 = vld [vmem:[#allocation8 + $0x84] sm:$0xf]  ;;  %v3429_v36 = vld [vmem:[#allocation8 + $0x74] sm:$0xf0] }
 0xb19   :  { %v1349_v26 = vpop.f32.mrf.mxu3 }
 0xb1a   :  { %v4279_v39 = vadd.f32 %v1349_v26, %v1320_v55  ;;  %v4285_v55 = vor.u32 %v3431_v27, %v3125_v59  ;;  %v3130_v26 = vor.u32 %v3430_v51, %v3127_v22  ;;  %v1837_v59 = vpop.f32.mrf.mxu2  ;;  %v4476_v27 = vld [vmem:[#allocation15_spill] sm:$0xff] }
 0xb1b   :  { %v1364_v49 = vpop.f32.mrf.mxu0 }
 0xb1c   :  { %v3428_v49 = vld [vmem:[#allocation8 + $0x74] sm:$0xf]  ;;  %1805 = vmatpush.bf16.msrb.mxu0 %v4285_v55 }
 0xb21   :  { %v1351_v16 = vpop.f32.mrf.mxu3 }
 0xb22   :  { %v3119_v16 = vld [vmem:[#allocation8 + $0x78] sm:$0xf0] }
 0xb23   :  { %v1611_v21 = vpop.f32.mrf.mxu0 }
 0xb29   :  { %v1597_v13 = vpop.f32.mrf.mxu3 }
 0xb2a   :  { %v1612_v15 = vadd.f32 %v1611_v21, %v1597_v13  ;;  %v4288_v21 = vor.u32 %v3429_v36, %v3117_v57  ;;  %v3122_v13 = vor.u32 %v3428_v49, %v3119_v16 }
 0xb2b   :  { %v1613_v37 = vpop.f32.mrf.mxu0 }
 0xb2c   :  { %v1715_v47 = vpack.c.bf16 %v1612_v15, %v1612_v15  ;;  %1806 = vmatpush.bf16.msrb.mxu0 %v4288_v21 }
 0xb2e   :  { %v1751_v40 = vsel %vm569_vm1, %v1715_v47, 0 }
 0xb2f   :  { %1760 = vmatpush.bf16.msra.mxu3 %v1751_v40 }
 0xb31   :  { %v1599_v17 = vpop.f32.mrf.mxu3 }
 0xb32   :  { %v1614_v30 = vadd.f32 %v1613_v37, %v1599_v17  ;;  %v3109_v17 = vld [vmem:[#allocation8 + $0x60] sm:$0xf] }
 0xb33   :  { %v1731_v41 = vpop.f32.mrf.mxu0  ;;  %1818 = vmatpush.bf16.msrb.mxu3 %v3130_v26 }
 0xb34   :  { %v1735_v19 = vsel %vm553_vm3, %v1731_v41, -inf  ;;  %v1877_v61 = vpack.c.bf16 %v1614_v30, %v1614_v30  ;;  %v3427_v30 = vld [vmem:[#allocation8 + $0x64] sm:$0xf0] }
 0xb35   :  { %1736 = vmax.xlane.f32.xlu2 %v1735_v19  ;;  %v3110_v19 = vor.u32 %v3427_v30, %v3109_v17 }
 0xb36   :  { %v1913_v54 = vsel %vm569_vm1, %v1877_v61, 0  ;;  %v3111_v61 = vld [vmem:[#allocation8 + $0x68] sm:$0xf0] }
 0xb37   :  { %1922 = vmatpush.bf16.msra.mxu1 %v1913_v54  ;;  %1819 = vmatpush.bf16.msrb.mxu3 %v3122_v13 }
 0xb38   :  { %1807 = vmatpush.bf16.msrb.mxu0 %v3110_v19 }
 0xb3b   :  { %v1733_v8 = vpop.f32.mrf.mxu0  ;;  %1950 = vmatpush.bf16.msrb.mxu1 %v3130_v26  ;;  %v1839_v26 = vpop.f32.mrf.mxu2 }
 0xb3c   :  { %1856 = vmatpush.bf16.msra.mxu0 %v3959_v56 }
 0xb3f   :  { %1951 = vmatpush.bf16.msrb.mxu1 %v3122_v13 }
 0xb40   :  { %1857 = vmatpush.bf16.msra.mxu0 %v3982_v5 }
 0xb43   :  { %v1842_v49 = vpop.f32.mrf.mxu2 }
 0xb44   :  { %1858 = vmatpush.bf16.msra.mxu0 %v4000_v14 }
 0xb48   :  { %1859 = vmatpush.bf16.msra.mxu0 %v4012_v20 }
 0xba8   :  { %v1737_v6 = vpop.xlane.xlu2 %1736 }
 0xba9   :  { %v1738_v0 = vsub.f32 %v1731_v41, %v1737_v6  ;;  %v3426_v41 = vld [vmem:[#allocation8 + $0x64] sm:$0xf] }
 0xbaa   :  { %v3114_v54 = vor.u32 %v3426_v41, %v3111_v61 }
 0xbab   :  { %v1739_v12 = vmul.f32 1.442695, %v1738_v0 }
 0xbac   :  { %1820 = vmatpush.bf16.msrb.mxu3 %v3114_v54  ;;  %1952 = vmatpush.bf16.msrb.mxu1 %v3114_v54 }
 0xbad   :  { %3495 = vpow2.f32 %v1739_v12 }
 0xbb3   :  { %v3496_v46 = vpop.eup %3495 }
 0xbb4   :  { %v1741_v1 = vsel %vm553_vm3, %v3496_v46, 0.0 }
 0xbb5   :  { %1742 = vadd.xlane.f32.xlu0 %v1741_v1 }
 0xc28   :  { %v1743_v15 = vpop.xlane.xlu0 %1742 }
 0xc29   :  { %3497 = vrcp.f32 %v1743_v15 }
 0xc2f   :  { %v3498_v37 = vpop.eup %3497 }
 0xc30   :  { %v1745_v47 = vmul.f32 %v3498_v37, %v3496_v46 }
 0xc32   :  { %v1746_v40 = vpack.c.bf16 %v1745_v47, %v1745_v47 }
 0xc34   :  { %3106 = vmatmul.msk.bf16.vlgmr.msra.gmra.mxu3 %vm553_vm3, %v1746_v40 }
 0xcb7   :  { %v1762_v8 = vpop.f32.mrf.mxu3 }
 0xcb8   :  { %v1766_v6 = vpack.c.bf16 %v1762_v8, %v1762_v8 }
 0xcba   :  { %3131 = vmatmul.msk.bf16.vlgmr.msrb.gmra.mxu0 %vm536_vm2, %v1766_v6  ;;  %3132 = vmatmul.msk.bf16.vlgmr.msrb.gmra.mxu3 %vm536_vm2, %v1766_v6  ;;  %v1489_v6 = vadd.f32 %v4227_v3, %v4225_v44 }
 0xcbf   :  { %v1764_v0 = vpop.f32.mrf.mxu3 }
 0xcca   :  { %3133 = vmatmul.msk.bf16.vlgmr.msra.gmra.mxu0 %vm276_vm0, %v4192_v58 }
 0xcda   :  { %3134 = vmatmul.msk.bf16.gmra.mxu0 %vm276_vm0, %v4211_v33  ;;  %v1844_v33 = vpop.f32.mrf.mxu2 }
 0xce2   :  { %v1847_v15 = vpop.f32.mrf.mxu2 }
 0xcea   :  { %3135 = vmatmul.msk.bf16.gmra.mxu0 %vm276_vm0, %v4215_v38  ;;  %v1849_v37 = vpop.f32.mrf.mxu2 }
 0xd37   :  { %v1809_v12 = vpop.f32.mrf.mxu0 }
 0xd38   :  { %v4305_v46 = vadd.f32 %v1809_v12, %v4171_v11  ;;  %v1876_v12 = vpack.c.bf16 %v1489_v6, %v1489_v6 }
 0xd3d   :  { %v1822_v1 = vpop.f32.mrf.mxu3 }
 0xd3e   :  { %v4308_v51 = vadd.f32 %v1822_v1, %v4476_v27 }
 0xd3f   :  { %v1811_v22 = vpop.f32.mrf.mxu0 }
 0xd45   :  { %v1824_v57 = vpop.f32.mrf.mxu3 }
 0xd47   :  { %v1861_v36 = vpop.f32.mrf.mxu0 }
 0xd48   :  { %v1862_v8 = vadd.f32 %v1861_v36, %v1837_v59 }
 0xd4f   :  { %v1863_v58 = vpop.f32.mrf.mxu0 }
 0xd50   :  { %v1864_v61 = vadd.f32 %v1863_v58, %v1839_v26  ;;  %v3443_v26 = vld [vmem:[#allocation5 + $0x178] sm:$0xff]  ;;  %v3442_v58 = vld [vmem:[#allocation5 + $0x170] sm:$0xff] }
 0xd52   :  { %v1878_v0 = vpack.c.bf16 %v1864_v61, %v1862_v8 }
 0xd57   :  { %v1866_v16 = vpop.f32.mrf.mxu0 }
 0xd58   :  { %v1867_v41 = vadd.f32 %v1866_v16, %v1842_v49 }
 0xd5f   :  { %v1868_v13 = vpop.f32.mrf.mxu0 }
 0xd60   :  { %v1869_v17 = vadd.f32 %v1868_v13, %v1844_v33 }
 0xd62   :  { %v1879_v54 = vpack.c.bf16 %v1869_v17, %v1867_v41  ;;  %v3432_v17 = vld [vmem:[#allocation5 + $0x120] sm:$0xff]  ;;  %v3266_v41 = vld [vmem:[#allocation7 + $0x98] sm:$0xf0] }
 0xd67   :  { %v1871_v38 = vpop.f32.mrf.mxu0 }
 0xd68   :  { %v1872_v11 = vadd.f32 %v1871_v38, %v1847_v15  ;;  %v3437_v15 = vld [vmem:[#allocation5 + $0x148] sm:$0xff]  ;;  %v3436_v38 = vld [vmem:[#allocation5 + $0x140] sm:$0xff] }
 0xd6f   :  { %v1873_v47 = vpop.f32.mrf.mxu0 }
 0xd70   :  { %v1874_v40 = vadd.f32 %v1873_v47, %v1849_v37  ;;  %v3435_v37 = vld [vmem:[#allocation5 + $0x138] sm:$0xff]  ;;  %v3440_v47 = vld [vmem:[#allocation5 + $0x160] sm:$0xff] }
 0xd72   :  { %v1880_v30 = vpack.c.bf16 %v1874_v40, %v1872_v11  ;;  %v3434_v11 = vld [vmem:[#allocation5 + $0x130] sm:$0xff]  ;;  %v3433_v40 = vld [vmem:[#allocation5 + $0x128] sm:$0xff] }
 0xd74   :  { %1889 = vmatpush.bf16.msra.mxu3 %v1880_v30  ;;  %v3456_v30 = vld [vmem:[#allocation7 + $0x94] sm:$0xf] }
 0xd78   :  { %1890 = vmatpush.bf16.msra.mxu3 %v1879_v54  ;;  %v4324_v54 = vor.u32 %v3456_v30, %v3266_v41 }
 0xd7c   :  { %1891 = vmatpush.bf16.msra.mxu3 %v1878_v0 }
 0xd7f   :  { %3136 = vmatmul.msk.bf16.vlgmr.msra.gmra.mxu3 %vm536_vm2, %v1876_v12  ;;  %v3449_v12 = vld [vmem:[%s4471_s5 + $0x148] sm:$0xff] }
 0xd80   :  { %1937 = vmatpush.bf16.msrb.mxu3 %v4285_v55  ;;  %v3439_v55 = vld [vmem:[#allocation5 + $0x158] sm:$0xff] }
 0xd81   :  { %2057 = vmatpush.bf16.msrb.mxu0 %v3439_v55  ;;  %v3444_v55 = vld [vmem:[%s4471_s5 + $0x120] sm:$0xff] }
 0xd84   :  { %1938 = vmatpush.bf16.msrb.mxu3 %v4288_v21  ;;  %v3438_v21 = vld [vmem:[#allocation5 + $0x150] sm:$0xff] }
 0xd85   :  { %2058 = vmatpush.bf16.msrb.mxu0 %v3438_v21  ;;  %v3453_v21 = vld [vmem:[%s4471_s5 + $0x168] sm:$0xff] }
 0xd88   :  { %1939 = vmatpush.bf16.msrb.mxu3 %v3110_v19  ;;  %v3441_v19 = vld [vmem:[#allocation5 + $0x168] sm:$0xff] }
 0xd89   :  { %2059 = vmatpush.bf16.msrb.mxu0 %v3437_v15 }
 0xd8c   :  { %2075 = vmatpush.bf16.msra.mxu3 %v3443_v26 }
 0xd8d   :  { %2060 = vmatpush.bf16.msrb.mxu0 %v3436_v38 }
 0xd90   :  { %2076 = vmatpush.bf16.msra.mxu3 %v3442_v58 }
 0xd91   :  { %2061 = vmatpush.bf16.msrb.mxu0 %v3435_v37 }
 0xd94   :  { %2077 = vmatpush.bf16.msra.mxu3 %v3441_v19 }
 0xd95   :  { %2062 = vmatpush.bf16.msrb.mxu0 %v3434_v11 }
 0xd98   :  { %2078 = vmatpush.bf16.msra.mxu3 %v3440_v47 }
 0xd99   :  { %2063 = vmatpush.bf16.msrb.mxu0 %v3433_v40 }
 0xd9d   :  { %2064 = vmatpush.bf16.msrb.mxu0 %v3432_v17 }
 0xda0   :  { %2065 = vmatmul.bf16.vlgmr.msrb.gmra.mxu0 %v3846_v63  ;;  %v3282_v63 = vld [vmem:[#allocation7 + $0xb8] sm:$0xf0] }
 0xda1   :  { %2288 = vmatpush.bf16.msra.mxu0 %v3754_v25 }
 0xda5   :  { %2289 = vmatpush.bf16.msra.mxu0 %v3779_v35  ;;  %v3458_v35 = vld [vmem:[#allocation7 + $0xa4] sm:$0xf] }
 0xda9   :  { %2290 = vmatpush.bf16.msra.mxu0 %v3804_v43  ;;  %v3274_v43 = vld [vmem:[#allocation7 + $0xa8] sm:$0xf0] }
 0xdad   :  { %2291 = vmatpush.bf16.msra.mxu0 %v3825_v52  ;;  %v4338_v52 = vor.u32 %v3458_v35, %v3274_v43 }
 0xdb0   :  { %3286 = vmatmul.msk.bf16.vlgmr.msra.gmra.mxu0 %vm276_vm0, %v4324_v54 }
 0xdb1   :  { %2422 = vmatpush.bf16.msrb.mxu0 %v3916_v29 }
 0xdb5   :  { %2423 = vmatpush.bf16.msrb.mxu0 %v3922_v32  ;;  %v3280_v32 = vld [vmem:[#allocation7 + $0xb0] sm:$0xf] }
 0xdb9   :  { %2424 = vmatpush.bf16.msrb.mxu0 %v3932_v45 }
 0xdbd   :  { %2425 = vmatpush.bf16.msrb.mxu0 %v3941_v48 }
 0xdc0   :  { %3287 = vmatmul.msk.bf16.gmra.mxu0 %vm276_vm0, %v4338_v52 }
 0xdc1   :  { %2426 = vmatpush.bf16.msrb.mxu0 %v3950_v53 }
 0xdc5   :  { %2427 = vmatpush.bf16.msrb.mxu0 %v3971_v60  ;;  %v3450_v60 = vld [vmem:[%s4471_s5 + $0x150] sm:$0xff] }
 0xdc9   :  { %2428 = vmatpush.bf16.msrb.mxu0 %v3991_v9 }
 0xdcd   :  { %2429 = vmatpush.bf16.msrb.mxu0 %v4009_v18 }
 0xe02   :  { %v1893_v1 = vpop.f32.mrf.mxu3 }
 0xe03   :  { %v1897_v27 = vsel %vm553_vm3, %v1893_v1, -inf }
 0xe04   :  { %1898 = vmax.xlane.f32.xlu1 %v1897_v27  ;;  %v3447_v27 = vld [vmem:[%s4471_s5 + $0x138] sm:$0xff] }
 0xe0a   :  { %v1895_v22 = vpop.f32.mrf.mxu3 }
 0xe1d   :  { %v2066_v0 = vpop.f32.mrf.mxu0 }
 0xe25   :  { %v2068_v22 = vpop.f32.mrf.mxu0 }
 0xe2d   :  { %v2293_v26 = vpop.f32.mrf.mxu0 }
 0xe77   :  { %v1899_v59 = vpop.xlane.xlu1 %1898 }
 0xe78   :  { %v1900_v57 = vsub.f32 %v1893_v1, %v1899_v59 }
 0xe7a   :  { %v1901_v36 = vmul.f32 1.442695, %v1900_v57  ;;  %v3455_v57 = vld [vmem:[%s4471_s5 + $0x178] sm:$0xff] }
 0xe7c   :  { %3499 = vpow2.f32 %v1901_v36 }
 0xe82   :  { %v3500_v44 = vpop.eup %3499 }
 0xe83   :  { %v1903_v3 = vsel %vm553_vm3, %v3500_v44, 0.0 }
 0xe84   :  { %1904 = vadd.xlane.f32.xlu2 %v1903_v3  ;;  %v3454_v3 = vld [vmem:[%s4471_s5 + $0x170] sm:$0xff] }
 0xef7   :  { %v1905_v49 = vpop.xlane.xlu2 %1904 }
 0xef8   :  { %3501 = vrcp.f32 %v1905_v49  ;;  %v3452_v49 = vld [vmem:[%s4471_s5 + $0x160] sm:$0xff] }
 0xefe   :  { %v3502_v16 = vpop.eup %3501 }
 0xeff   :  { %v1907_v33 = vmul.f32 %v3502_v16, %v3500_v44  ;;  %v3445_v44 = vld [vmem:[%s4471_s5 + $0x128] sm:$0xff] }
 0xf01   :  { %v1908_v13 = vpack.c.bf16 %v1907_v33, %v1907_v33  ;;  %v2295_v33 = vpop.f32.mrf.mxu0 }
 0xf03   :  { %3137 = vmatmul.msk.bf16.vlgmr.msra.gmra.mxu1 %vm553_vm3, %v1908_v13 }
 0xf04   :  { %2200 = vmatpush.bf16.msra.mxu1 %v3455_v57  ;;  %v3464_v57 = vld [vmem:[#allocation8 + $0xa4] sm:$0xf] }
 0xf08   :  { %2201 = vmatpush.bf16.msra.mxu1 %v3454_v3 }
 0xf09   :  { %v2298_v15 = vpop.f32.mrf.mxu0 }
 0xf0c   :  { %2202 = vmatpush.bf16.msra.mxu1 %v3453_v21 }
 0xf10   :  { %2203 = vmatpush.bf16.msra.mxu1 %v3452_v49  ;;  %v3293_v49 = vld [vmem:[#allocation8 + $0x90] sm:$0xf] }
 0xf11   :  { %v2300_v37 = vpop.f32.mrf.mxu0 }
 0xf80   :  { %v1924_v61 = vpop.f32.mrf.mxu1 }
 0xf81   :  { %v1928_v8 = vpack.c.bf16 %v1924_v61, %v1924_v61 }
 0xf83   :  { %3138 = vmatmul.msk.bf16.vlgmr.msrb.gmra.mxu3 %vm536_vm2, %v1928_v8  ;;  %3139 = vmatmul.msk.bf16.vlgmr.msrb.gmra.mxu1 %vm536_vm2, %v1928_v8 }
 0xf84   :  { %2260 = vmatpush.bf16.msrb.mxu3 %v3752_v24  ;;  %v3264_v24 = vld [vmem:[#allocation7 + $0x90] sm:$0xf] }
 0xf88   :  { %v1926_v25 = vpop.f32.mrf.mxu1  ;;  %2261 = vmatpush.bf16.msrb.mxu3 %v3777_v34  ;;  %v3457_v34 = vld [vmem:[#allocation7 + $0x94] sm:$0xf0] }
 0xf8c   :  { %2262 = vmatpush.bf16.msrb.mxu3 %v3802_v42  ;;  %v3265_v42 = vor.u32 %v3457_v34, %v3264_v24 }
 0xf90   :  { %2263 = vmatpush.bf16.msrb.mxu3 %v3823_v50  ;;  %v3460_v50 = vld [vmem:[#allocation7 + $0xb4] sm:$0xf] }
 0xf91   :  { %v4351_v29 = vor.u32 %v3460_v50, %v3282_v63 }
 0xf93   :  { %3188 = vmatmul.msk.bf16.vlgmr.msra.gmra.mxu3 %vm276_vm0, %v3762_v28  ;;  %3288 = vmatmul.msk.bf16.gmra.mxu0 %vm276_vm0, %v4351_v29  ;;  %v3272_v28 = vld [vmem:[#allocation7 + $0xa0] sm:$0xf] }
 0xf94   :  { %2264 = vmatpush.bf16.msrb.mxu3 %v3844_v62  ;;  %v3459_v62 = vld [vmem:[#allocation7 + $0xa4] sm:$0xf0]  ;;  %3261 = vmatmul.msk.bf16.vlgmr.msra.gmra.mxu1 %vm276_vm0, %v3770_v31 }
 0xf98   :  { %2265 = vmatpush.bf16.msrb.mxu3 %v3859_v4  ;;  %v3273_v4 = vor.u32 %v3459_v62, %v3272_v28 }
 0xf9c   :  { %2266 = vmatpush.bf16.msrb.mxu3 %v3872_v7  ;;  %v3461_v7 = vld [vmem:[#allocation7 + $0xb4] sm:$0xf0] }
 0xf9d   :  { %v3281_v45 = vor.u32 %v3461_v7, %v3280_v32 }
 0xfa0   :  { %2267 = vmatpush.bf16.msrb.mxu3 %v3881_v10  ;;  %v3451_v10 = vld [vmem:[%s4471_s5 + $0x158] sm:$0xff] }
 0xfa1   :  { %2182 = vmatpush.bf16.msrb.mxu2 %v3451_v10 }
 0xfa3   :  { %2268 = vmatmul.bf16.vlgmr.msrb.gmra.mxu3 %v3265_v42  ;;  %2430 = vmatmul.bf16.vlgmr.msrb.gmra.mxu0 %v3265_v42 }
 0xfa5   :  { %2183 = vmatpush.bf16.msrb.mxu2 %v3450_v60 }
 0xfa9   :  { %2184 = vmatpush.bf16.msrb.mxu2 %v3449_v12  ;;  %v3467_v12 = vld [vmem:[#allocation8 + $0xb4] sm:$0xf0] }
 0xfb3   :  { %2273 = vmatmul.bf16.gmra.mxu3 %v3273_v4  ;;  %2435 = vmatmul.bf16.gmra.mxu0 %v3273_v4 }
 0xfc3   :  { %2278 = vmatmul.bf16.gmra.mxu3 %v3281_v45  ;;  %2440 = vmatmul.bf16.gmra.mxu0 %v3281_v45 }
0x1000   :  { %v1954_v48 = vpop.f32.mrf.mxu1 }
0x1001   :  { %v4359_v53 = vadd.f32 %v1954_v48, %v4277_v23  ;;  %v3448_v23 = vld [vmem:[%s4471_s5 + $0x140] sm:$0xff] }
0x1002   :  { %2185 = vmatpush.bf16.msrb.mxu2 %v3448_v23  ;;  %v3466_v23 = vld [vmem:[#allocation8 + $0xb4] sm:$0xf] }
0x1006   :  { %v1941_v9 = vpop.f32.mrf.mxu3  ;;  %2186 = vmatpush.bf16.msrb.mxu2 %v3447_v27  ;;  %v3311_v27 = vld [vmem:[#allocation8 + $0xb8] sm:$0xf0] }
0x1007   :  { %v4365_v18 = vadd.f32 %v1941_v9, %v4279_v39  ;;  %v3446_v39 = vld [vmem:[%s4471_s5 + $0x130] sm:$0xff] }
0x1008   :  { %v1956_v6 = vpop.f32.mrf.mxu1 }
0x100a   :  { %2187 = vmatpush.bf16.msrb.mxu2 %v3446_v39  ;;  %v3465_v39 = vld [vmem:[#allocation8 + $0xa4] sm:$0xf0] }
0x100e   :  { %v1943_v1 = vpop.f32.mrf.mxu3  ;;  %2188 = vmatpush.bf16.msrb.mxu2 %v3445_v44 }
0x1010   :  { %v2303_v11 = vpop.f32.mrf.mxu0 }
0x1011   :  { %v2205_v42 = vpop.f32.mrf.mxu1 }
0x1012   :  { %2189 = vmatpush.bf16.msrb.mxu2 %v3444_v55 }
0x1015   :  { %2190 = vmatmul.bf16.vlgmr.msrb.gmra.mxu2 %v3854_v2 }
0x1016   :  { %v2080_v59 = vpop.f32.mrf.mxu3 }
0x1017   :  { %v2081_v36 = vadd.f32 %v2080_v59, %v2066_v0  ;;  %v3309_v0 = vld [vmem:[#allocation8 + $0xb0] sm:$0xf]  ;;  %v4408_v59 = vor.u32 %v3466_v23, %v3311_v27 }
0x1018   :  { %v2305_v30 = vpop.f32.mrf.mxu0  ;;  %v3310_v1 = vor.u32 %v3467_v12, %v3309_v0 }
0x1019   :  { %v2308_v34 = vpack.c.bf16 %v2081_v36, %v2081_v36  ;;  %v4404_v4 = vpop.f32.mrf.mxu1  ;;  %v3303_v36 = vld [vmem:[#allocation8 + $0xa8] sm:$0xf0] }
0x101a   :  { %2531 = vmatpush.bf16.msra.mxu3 %v3310_v1  ;;  %v4411_v3 = vor.u32 %v3464_v57, %v3303_v36 }
0x101e   :  { %v2082_v58 = vpop.f32.mrf.mxu3 }
0x101f   :  { %v4394_v19 = vadd.f32 %v2082_v58, %v2068_v22  ;;  %v3301_v22 = vld [vmem:[#allocation8 + $0xa0] sm:$0xf] }
0x1020   :  { %v3302_v44 = vor.u32 %v3465_v39, %v3301_v22 }
0x1021   :  { %v2470_v12 = vpack.c.bf16 %v4394_v19, %v4394_v19 }
0x1022   :  { %2532 = vmatpush.bf16.msra.mxu3 %v3302_v44 }
0x1026   :  { %v2269_v16 = vpop.f32.mrf.mxu3 }
0x1027   :  { %v2294_v24 = vadd.f32 %v2293_v26, %v2269_v16  ;;  %v3463_v16 = vld [vmem:[#allocation8 + $0x94] sm:$0xf0] }
0x102e   :  { %v2271_v13 = vpop.f32.mrf.mxu3 }
0x102f   :  { %v2296_v35 = vadd.f32 %v2295_v33, %v2271_v13  ;;  %v3462_v33 = vld [vmem:[#allocation8 + $0x94] sm:$0xf]  ;;  %v3294_v13 = vor.u32 %v3463_v16, %v3293_v49 }
0x1031   :  { %v2310_v31 = vpack.c.bf16 %v2296_v35, %v2294_v24  ;;  %2533 = vmatpush.bf16.msra.mxu3 %v3294_v13 }
0x1036   :  { %v2274_v38 = vpop.f32.mrf.mxu3 }
0x1037   :  { %v2299_v25 = vadd.f32 %v2298_v15, %v2274_v38  ;;  %v3295_v15 = vld [vmem:[#allocation8 + $0x98] sm:$0xf0] }
0x1038   :  { %v3298_v38 = vor.u32 %v3462_v33, %v3295_v15 }
0x103e   :  { %v2276_v47 = vpop.f32.mrf.mxu3 }
0x103f   :  { %v2301_v61 = vadd.f32 %v2300_v37, %v2276_v47 }
0x1041   :  { %v2311_v43 = vpack.c.bf16 %v2301_v61, %v2299_v25 }
0x1046   :  { %v2279_v40 = vpop.f32.mrf.mxu3 }
0x1047   :  { %v2304_v2 = vadd.f32 %v2303_v11, %v2279_v40 }
0x104e   :  { %v2281_v17 = vpop.f32.mrf.mxu3 }
0x104f   :  { %v2306_v41 = vadd.f32 %v2305_v30, %v2281_v17  ;;  %v2431_v30 = vpop.f32.mrf.mxu0 }
0x1051   :  { %v2312_v8 = vpack.c.bf16 %v2306_v41, %v2304_v2 }
0x1053   :  { %2321 = vmatpush.bf16.msrb.mxu1 %v2312_v8 }
0x1057   :  { %2322 = vmatpush.bf16.msrb.mxu1 %v2311_v43  ;;  %v2433_v25 = vpop.f32.mrf.mxu0 }
0x105b   :  { %2323 = vmatpush.bf16.msrb.mxu1 %v2310_v31 }
0x105e   :  { %3289 = vmatmul.msk.bf16.vlgmr.msrb.gmra.mxu1 %vm536_vm2, %v2308_v34 }
0x105f   :  { %2399 = vmatpush.bf16.msra.mxu1 %v3310_v1  ;;  %v2436_v35 = vpop.f32.mrf.mxu0 }
0x1063   :  { %2400 = vmatpush.bf16.msra.mxu1 %v3302_v44 }
0x1067   :  { %2401 = vmatpush.bf16.msra.mxu1 %v3294_v13  ;;  %v2438_v24 = vpop.f32.mrf.mxu0 }
0x106b   :  { %2450 = vmatpush.bf16.msrb.mxu1 %v3959_v56  ;;  %v4430_v56 = vld [vmem:[%s4473_s7] sm:$0x3]  ;;  %s3649_s7 = smov [#allocation10]  }
0x106c   :  { %s2571_s4 = sshll.u32 %s3649_s7, 4  ;;  %s2572_s4 = int_to_ptr.vmem [resolvable:$true] %s2571_s4 }
0x106f   :  { %2451 = vmatpush.bf16.msrb.mxu1 %v3982_v5  ;;  %v2555_v5 = vperm.slane %v4430_v56, 0  ;;  %v2441_v34 = vpop.f32.mrf.mxu0 }
0x1073   :  { %2452 = vmatpush.bf16.msrb.mxu1 %v4000_v14 }
0x1077   :  { %2453 = vmatpush.bf16.msrb.mxu1 %v4012_v20 }
0x1098   :  { %v2191_v50 = vpop.f32.mrf.mxu2 }
0x1099   :  { %v2206_v63 = vadd.f32 %v2205_v42, %v2191_v50  ;;  %v2443_v50 = vpop.f32.mrf.mxu0 }
0x109b   :  { %v2309_v28 = vpack.c.bf16 %v2206_v63, %v2206_v63 }
0x109d   :  { %v2345_v62 = vsel %vm569_vm1, %v2309_v28, 0 }
0x109e   :  { %2354 = vmatpush.bf16.msra.mxu2 %v2345_v62 }
0x10a0   :  { %v2193_v37 = vpop.f32.mrf.mxu2 }
0x10a2   :  { %2412 = vmatpush.bf16.msrb.mxu2 %v4408_v59 }
0x10a6   :  { %2413 = vmatpush.bf16.msrb.mxu2 %v4411_v3 }
0x10aa   :  { %2414 = vmatpush.bf16.msrb.mxu2 %v3298_v38 }
0x10db   :  { %v2325_v32 = vpop.f32.mrf.mxu1 }
0x10dc   :  { %v2329_v7 = vsel %vm553_vm3, %v2325_v32, -inf }
0x10dd   :  { %2330 = vmax.xlane.f32.xlu0 %v2329_v7  ;;  %v2208_v7 = vadd.f32 %v4404_v4, %v2193_v37 }
0x10e3   :  { %v2327_v45 = vpop.f32.mrf.mxu1 }
0x1150   :  { %v2331_v48 = vpop.xlane.xlu0 %2330 }
0x1151   :  { %v2332_v10 = vsub.f32 %v2325_v32, %v2331_v48 }
0x1153   :  { %v2333_v60 = vmul.f32 1.442695, %v2332_v10 }
0x1155   :  { %3503 = vpow2.f32 %v2333_v60  ;;  %v2471_v60 = vpack.c.bf16 %v2208_v7, %v2208_v7 }
0x1157   :  { %v2507_v0 = vsel %vm569_vm1, %v2471_v60, 0 }
0x115b   :  { %v3504_v9 = vpop.eup %3503 }
0x115c   :  { %v2335_v6 = vsel %vm553_vm3, %v3504_v9, 0.0 }
0x115d   :  { %2336 = vadd.xlane.f32.xlu1 %v2335_v6 }
0x11d0   :  { %v2337_v26 = vpop.xlane.xlu1 %2336 }
0x11d1   :  { %3505 = vrcp.f32 %v2337_v26 }
0x11d7   :  { %v3506_v55 = vpop.eup %3505 }
0x11d8   :  { %v2339_v58 = vmul.f32 %v3506_v55, %v3504_v9 }
0x11da   :  { %v2340_v21 = vpack.c.bf16 %v2339_v58, %v2339_v58 }
0x11dc   :  { %3290 = vmatmul.msk.bf16.vlgmr.msra.gmra.mxu2 %vm553_vm3, %v2340_v21 }
0x125f   :  { %v2356_v47 = vpop.f32.mrf.mxu2 }
0x1260   :  { %v2360_v11 = vpack.c.bf16 %v2356_v47, %v2356_v47 }
0x1262   :  { %3315 = vmatmul.msk.bf16.vlgmr.msra.gmra.mxu1 %vm536_vm2, %v2360_v11  ;;  %3316 = vmatmul.msk.bf16.vlgmr.msrb.gmra.mxu2 %vm536_vm2, %v2360_v11 }
0x1267   :  { %v2358_v40 = vpop.f32.mrf.mxu2 }
0x1272   :  { %3317 = vmatmul.msk.bf16.vlgmr.msrb.gmra.mxu1 %vm276_vm0, %v4324_v54  ;;  %v2556_v54 = vperm.slane %v4430_v56, 1 }
0x1282   :  { %3318 = vmatmul.msk.bf16.gmra.mxu1 %vm276_vm0, %v4338_v52 }
0x1292   :  { %3319 = vmatmul.msk.bf16.gmra.mxu1 %vm276_vm0, %v4351_v29 }
0x12df   :  { %v2403_v14 = vpop.f32.mrf.mxu1 }
0x12e0   :  { %v2420_v20 = vadd.f32 %v2403_v14, %v4305_v46 }
0x12e2   :  { %v2559_v17 = vadd.f32 %v2555_v5, %v2420_v20 }
0x12e4   :  { %2561 = vst [vmem:[#allocation10] sm:$0xff] %v2559_v17 }
0x12e5   :  { %v2416_v52 = vpop.f32.mrf.mxu2 }
0x12e6   :  { %v2421_v29 = vadd.f32 %v2416_v52, %v4308_v51 }
0x12e7   :  { %v2405_v2 = vpop.f32.mrf.mxu1 }
0x12e8   :  { %v2560_v41 = vadd.f32 %v2556_v54, %v2421_v29 }
0x12ea   :  { %2562 = vst.msk [vmem:[#allocation10 + $0x8] sm:$0xff] %vm276_vm0, %v2560_v41 }
0x12ed   :  { %v2418_v61 = vpop.f32.mrf.mxu2 }
0x12ef   :  { %v2455_v8 = vpop.f32.mrf.mxu1 }
0x12f0   :  { %v2456_v9 = vadd.f32 %v2455_v8, %v2431_v30 }
0x12f7   :  { %v2457_v46 = vpop.f32.mrf.mxu1 }
0x12f8   :  { %v2458_v48 = vadd.f32 %v2457_v46, %v2433_v25 }
0x12fa   :  { %v2472_v6 = vpack.c.bf16 %v2458_v48, %v2456_v9 }
0x12ff   :  { %v2460_v43 = vpop.f32.mrf.mxu1 }
0x1300   :  { %v2461_v45 = vadd.f32 %v2460_v43, %v2436_v35 }
0x1307   :  { %v2462_v31 = vpop.f32.mrf.mxu1 }
0x1308   :  { %v2463_v62 = vadd.f32 %v2462_v31, %v2438_v24 }
0x130a   :  { %v2473_v10 = vpack.c.bf16 %v2463_v62, %v2461_v45 }
0x130f   :  { %v2465_v42 = vpop.f32.mrf.mxu1 }
0x1310   :  { %v2466_v28 = vadd.f32 %v2465_v42, %v2441_v34 }
0x1317   :  { %v2467_v63 = vpop.f32.mrf.mxu1 }
0x1318   :  { %v2468_v51 = vadd.f32 %v2467_v63, %v2443_v50 }
0x131a   :  { %v2474_v32 = vpack.c.bf16 %v2468_v51, %v2466_v28 }
0x131c   :  { %2483 = vmatpush.bf16.msra.mxu2 %v2474_v32 }
0x1320   :  { %2484 = vmatpush.bf16.msra.mxu2 %v2473_v10 }
0x1324   :  { %2485 = vmatpush.bf16.msra.mxu2 %v2472_v6 }
0x1327   :  { %3320 = vmatmul.msk.bf16.vlgmr.msra.gmra.mxu2 %vm536_vm2, %v2470_v12 }
0x1328   :  { %2516 = vmatpush.bf16.msrb.mxu2 %v2507_v0 }
0x132c   :  { %2544 = vmatpush.bf16.msra.mxu2 %v4408_v59 }
0x1330   :  { %2545 = vmatpush.bf16.msra.mxu2 %v4411_v3 }
0x1334   :  { %2546 = vmatpush.bf16.msra.mxu2 %v3298_v38 }
0x13aa   :  { %v2487_v4 = vpop.f32.mrf.mxu2 }
0x13ab   :  { %v2491_v23 = vsel %vm553_vm3, %v2487_v4, -inf }
0x13ac   :  { %2492 = vmax.xlane.f32.xlu2 %v2491_v23 }
0x13b2   :  { %v2489_v1 = vpop.f32.mrf.mxu2 }
0x141f   :  { %v2493_v27 = vpop.xlane.xlu2 %2492 }
0x1420   :  { %v2494_v22 = vsub.f32 %v2487_v4, %v2493_v27 }
0x1422   :  { %v2495_v39 = vmul.f32 1.442695, %v2494_v22 }
0x1424   :  { %3507 = vpow2.f32 %v2495_v39 }
0x142a   :  { %v3508_v57 = vpop.eup %3507 }
0x142b   :  { %v2497_v19 = vsel %vm553_vm3, %v3508_v57, 0.0 }
0x142c   :  { %2498 = vadd.xlane.f32.xlu0 %v2497_v19 }
0x149f   :  { %v2499_v36 = vpop.xlane.xlu0 %2498 }
0x14a0   :  { %3509 = vrcp.f32 %v2499_v36 }
0x14a6   :  { %v3510_v44 = vpop.eup %3509 }
0x14a7   :  { %v2501_v59 = vmul.f32 %v3510_v44, %v3508_v57 }
0x14a9   :  { %v2502_v26 = vpack.c.bf16 %v2501_v59, %v2501_v59 }
0x14ab   :  { %3321 = vmatmul.msk.bf16.vlgmr.msrb.gmra.mxu2 %vm553_vm3, %v2502_v26 }
0x152e   :  { %v2518_v3 = vpop.f32.mrf.mxu2 }
0x152f   :  { %v2522_v55 = vpack.c.bf16 %v2518_v3, %v2518_v3 }
0x1531   :  { %3322 = vmatmul.msk.bf16.vlgmr.msra.gmra.mxu3 %vm536_vm2, %v2522_v55  ;;  %3323 = vmatmul.msk.bf16.vlgmr.msra.gmra.mxu2 %vm536_vm2, %v2522_v55 }
0x1536   :  { %v2520_v58 = vpop.f32.mrf.mxu2 }
0x15b4   :  { %v2535_v21 = vpop.f32.mrf.mxu3  ;;  %v2548_v49 = vpop.f32.mrf.mxu2 }
0x15b5   :  { %v2552_v16 = vadd.f32 %v2535_v21, %v4365_v18  ;;  %v2553_v33 = vadd.f32 %v2548_v49, %v4359_v53 }
0x15b7   :  { %v2563_v13 = vadd.f32 %v2555_v5, %v2552_v16  ;;  %v2564_v15 = vadd.f32 %v2556_v54, %v2553_v33 }
0x15b9   :  { %2565 = vst [vmem:[#allocation10 + $0x10] sm:$0xff] %v2563_v13 }
0x15ba   :  { %2566 = vst.msk [vmem:[#allocation10 + $0x18] sm:$0xff] %vm276_vm0, %v2564_v15 }
0x15bb   :  { %2579 = dma.vmem_to_hbm [thread:$0]  %s2572_s4, 512, %s2574_s30, [#allocation4], %s3643_s17, %s3643_s17, %s3644_s18  }
0x15bc   :  { %v2537_v53 = vpop.f32.mrf.mxu3  ;;  %v2550_v18 = vpop.f32.mrf.mxu2 }
0x15bd   :  { %3637 = dma.done.wait [#allocation4], 512  }
0x15be   :  { %3638 = vsyncadd [#allocation4], 4294966784 }
0x15bf   :  { %2584 = vsyncpa [#allocation3], 1 }
0x15c0   :  { %2585 = vsyncpa [#allocation6], 1 }
0x15c1   :  { %2586 = vsyncpa [#allocation9], 1 }
0x15c2   :  { %2587 = vsyncpa [#allocation4], 1 }

</bundles_post_ra>
